<compile_context>
chip_gen: v7x
topology: tpu7x:2x2x1
jax: 0.10.0
libtpu: 0.0.40
codegen_flags: <defaults>
</compile_context>

<pallas_src>
import math

import jax
import jax.numpy as jnp
from jax.experimental import pallas as pl
from jax.experimental.pallas import tpu as pltpu

# ---- configuration (small, consistent with the module's constructor math) ----
B = 2            # batch
SQ = 8           # query sequence length (hidden_states / query_hidden_states)
SKV = 16         # key/value sequence length (inputs / encoder_hidden_states)
HIDDEN = 32      # hidden_size (output dim of the layer)
HIDDEN_IN = 64   # hidden_size_input (dim of `inputs`), dim_reduction=2 -> reduced=32
DIM_RED = 2
NUM_HEADS = 4
HEAD_SIZE = (HIDDEN_IN // DIM_RED) // NUM_HEADS          # 8
ALL_HEAD = NUM_HEADS * HEAD_SIZE                         # 32 == HIDDEN
QUERY_DIM = HIDDEN_IN                                    # hidden_size_query default
DQP = QUERY_DIM + HIDDEN                                 # 96, concat(query_hs, hidden)
HCAT = HIDDEN + HIDDEN_IN                                # 96, concat(h1, query_hs)
INTER = 4 * HIDDEN                                       # 128
EPS = 1e-12

BQ = B * SQ        # 16 flattened query-side rows
BKV = B * SKV      # 32 flattened key/value-side rows
VEC_W = INTER      # 128, lane width of the packed small-vector-parameter rows
VEC_ROWS = 9
VEC_ROWS_PAD = 16

# packed-slab row offsets
S32_WQQ = 0                          # rows [0,64)   : wq (qhs part), pre-scaled
S32_WQH = QUERY_DIM                  # rows [64,96)  : wq (hidden part), pre-scaled
S32_W2 = QUERY_DIM + HIDDEN          # rows [96,224) : w2
S32_ROWS = S32_W2 + INTER            # 224

S128_WIH = 0                         # rows [0,32)   : wi (h1 part)
S128_WIQ = HIDDEN                    # rows [32,96)  : wi (qhs part)
VEC_OFF = HIDDEN + QUERY_DIM         # rows [96,105) : packed bias / LN vectors
S128_ROWS = VEC_OFF + VEC_ROWS_PAD   # 112

KVO_W = NUM_HEADS * HIDDEN + ALL_HEAD   # 160: lanes [0,128)=V∘Wo per head, [128,160)=K


def _layer_norm(x, gamma, beta):
    mu = jnp.mean(x, axis=-1, keepdims=True)
    var = jnp.mean((x - mu) ** 2, axis=-1, keepdims=True)
    return (x - mu) * jax.lax.rsqrt(var + EPS) * gamma + beta


def bert_reduce_add_kernel(kv_ref, hid_ref, qhs_ref, wkvo_ref, s32_ref, s128_ref, out_ref):
    f32 = jnp.float32
    kv = kv_ref[...]       # (BKV, HIDDEN_IN)
    hid = hid_ref[...]     # (BQ, HIDDEN)
    qhs = qhs_ref[...]     # (BQ, QUERY_DIM)

    vec = s128_ref[VEC_OFF:VEC_OFF + VEC_ROWS, :]    # (9, 128) packed small vectors
    bq = vec[0:1, :ALL_HEAD]      # query bias, pre-scaled by 1/sqrt(d)
    bk = vec[1:2, :ALL_HEAD]
    bvo = vec[2:3, :HIDDEN]       # bv @ wo + bo (folded)
    g1 = vec[3:4, :HIDDEN]
    be1 = vec[4:5, :HIDDEN]
    bi = vec[5:6, :]
    b2 = vec[6:7, :HIDDEN]
    g2 = vec[7:8, :HIDDEN]
    be2 = vec[8:9, :HIDDEN]

    # --- dimension-reduced cross attention ---
    # query projection: split weight replaces concat([qhs, hid]) @ wq; 1/sqrt(d) folded offline
    q = (jnp.dot(qhs, s32_ref[S32_WQQ:S32_WQQ + QUERY_DIM, :], preferred_element_type=f32)
         + jnp.dot(hid, s32_ref[S32_WQH:S32_WQH + HIDDEN, :], preferred_element_type=f32)
         + bq)                                                            # (BQ, 32)

    # fused (V∘Wo | K) projection: one lane-dense matmul, N = 160
    kvo = jnp.dot(kv, wkvo_ref[...], preferred_element_type=f32)          # (BKV, 160)

    # single (32,32) transpose of the K projection (replaces 8 per-head transposes)
    kT = (kvo[:, NUM_HEADS * HIDDEN:] + bk).T                             # (ALL_HEAD, BKV)

    # per-(batch, head) score tiles, stacked along sublanes -> one softmax pass
    tiles = []
    for b in range(B):
        for h in range(NUM_HEADS):
            q_bh = q[b * SQ:(b + 1) * SQ, h * HEAD_SIZE:(h + 1) * HEAD_SIZE]
            kT_bh = kT[h * HEAD_SIZE:(h + 1) * HEAD_SIZE, b * SKV:(b + 1) * SKV]
            tiles.append(jnp.dot(q_bh, kT_bh, preferred_element_type=f32))
    scores = jnp.concatenate(tiles, axis=0)                               # (B*NH*SQ, SKV)

    scores = scores - jnp.max(scores, axis=-1, keepdims=True)
    pexp = jnp.exp(scores)
    ssum = jnp.sum(pexp, axis=-1, keepdims=True)
    r = pl.reciprocal(ssum, approx=True)
    r = r * (2.0 - ssum * r)          # one Newton step -> full f32 precision
    probs = pexp * r                                                       # (B*NH*SQ, SKV)

    # attention output: Wo is pre-folded into V, so attn_b = sum_h p_bh @ vproj_bh  (N=32)
    attn_rows = []
    for b in range(B):
        acc = None
        for h in range(NUM_HEADS):
            row = (b * NUM_HEADS + h) * SQ
            p_bh = probs[row:row + SQ, :]
            v_bh = kvo[b * SKV:(b + 1) * SKV, h * HIDDEN:(h + 1) * HIDDEN]
            part = jnp.dot(p_bh, v_bh, preferred_element_type=f32)        # (SQ, HIDDEN)
            acc = part if acc is None else acc + part
        attn_rows.append(acc)
    attn_out = jnp.concatenate(attn_rows, axis=0) + bvo                   # (BQ, HIDDEN)

    # --- residual + LayerNorm ---
    h1 = _layer_norm(attn_out + hid, g1, be1)

    # --- intermediate: split weight replaces concat([h1, qhs]) @ wi; exact-erf GELU ---
    inter = (jnp.dot(h1, s128_ref[S128_WIH:S128_WIH + HIDDEN, :], preferred_element_type=f32)
             + jnp.dot(qhs, s128_ref[S128_WIQ:S128_WIQ + QUERY_DIM, :], preferred_element_type=f32)
             + bi)
    inter = 0.5 * inter * (1.0 + jax.lax.erf(inter * (1.0 / math.sqrt(2.0))))

    # --- output projection + residual + LayerNorm ---
    oi = jnp.dot(inter, s32_ref[S32_W2:S32_W2 + INTER, :], preferred_element_type=f32) + b2
    out_ref[...] = _layer_norm(oi + h1, g2, be2)


# ----------------------------- one-time parameter packing -----------------------------
def prepare_params(p):
    """Done once at init/caching time; no per-call XLA ops remain in the wrapper."""
    scale = 1.0 / math.sqrt(HEAD_SIZE)
    wq_s = p["wq"] * scale                                    # (96, 32), scale folded
    bq_s = p["bq"] * scale                                    # (1, 32)

    # fold the output projection into V per head: wvo_h = wv[:,h] @ wo[h,:]
    wvo = jnp.concatenate(
        [p["wv"][:, h * HEAD_SIZE:(h + 1) * HEAD_SIZE]
         @ p["wo"][h * HEAD_SIZE:(h + 1) * HEAD_SIZE, :] for h in range(NUM_HEADS)],
        axis=1)                                               # (64, 128)
    bvo = p["bv"] @ p["wo"] + p["bo"]                         # (1, 32)  (softmax rows sum to 1)

    w_kvo = jnp.concatenate([wvo, p["wk"]], axis=1)           # (64, 160)
    slab32 = jnp.concatenate([wq_s, p["w2"]], axis=0)         # (224, 32)

    def row(v):
        v = jnp.asarray(v, jnp.float32).reshape(-1)
        return jnp.pad(v, (0, VEC_W - v.shape[0]))

    vec = jnp.stack([
        row(bq_s),        # 0
        row(p["bk"]),     # 1
        row(bvo),         # 2
        row(p["g1"]),     # 3
        row(p["be1"]),    # 4
        row(p["bi"]),     # 5
        row(p["b2"]),     # 6
        row(p["g2"]),     # 7
        row(p["be2"]),    # 8
    ], axis=0)                                                # (9, 128)
    vec = jnp.pad(vec, ((0, VEC_ROWS_PAD - VEC_ROWS), (0, 0)))  # (16, 128)

    slab128 = jnp.concatenate([p["wi"], vec], axis=0)         # (112, 128)

    assert slab32.shape == (S32_ROWS, HIDDEN)
    assert slab128.shape == (S128_ROWS, VEC_W)
    assert w_kvo.shape == (HIDDEN_IN, KVO_W)
    return {"w_kvo": w_kvo, "slab32": slab32, "slab128": slab128}


# ----------------------------- per-call wrapper -----------------------------
@jax.jit
def bert_reduce_add_layer(inputs, hidden_states, query_hidden_states, packed):
    """inputs: (B,SKV,HIDDEN_IN); hidden_states: (B,SQ,HIDDEN); query_hidden_states: (B,SQ,QUERY_DIM)."""
    # free row-major reshapes: flatten batch into rows
    kv_flat = inputs.reshape(BKV, HIDDEN_IN)
    hid_flat = hidden_states.reshape(BQ, HIDDEN)
    qhs_flat = query_hidden_states.reshape(BQ, QUERY_DIM)

    args = (kv_flat, hid_flat, qhs_flat,
            packed["w_kvo"], packed["slab32"], packed["slab128"])

    def full_spec(a):
        return pl.BlockSpec(a.shape, lambda i: (0,) * a.ndim)

    out = pl.pallas_call(
        bert_reduce_add_kernel,
        out_shape=jax.ShapeDtypeStruct((BQ, HIDDEN), jnp.float32),
        grid_spec=pltpu.PrefetchScalarGridSpec(
            num_scalar_prefetch=0,
            grid=(1,),                          # single invocation: total work is tiny
            in_specs=[full_spec(a) for a in args],
            out_specs=pl.BlockSpec((BQ, HIDDEN), lambda i: (0, 0)),
        ),
        compiler_params=pltpu.CompilerParams(dimension_semantics=("arbitrary",)),
        cost_estimate=pl.CostEstimate(
            flops=1_400_000, transcendentals=3_200, bytes_accessed=145_000),
    )(*args)
    return out.reshape(B, SQ, HIDDEN)


# ----------------------------- parameter init -----------------------------
def init_params(key):
    """Deterministic synthetic parameters (PyTorch-Linear-style uniform init)."""
    def linear(key, fan_in, fan_out):
        k1, k2 = jax.random.split(key)
        bound = 1.0 / math.sqrt(fan_in)
        w = jax.random.uniform(k1, (fan_in, fan_out), jnp.float32, -bound, bound)
        b = jax.random.uniform(k2, (1, fan_out), jnp.float32, -bound, bound)
        return w, b

    keys = jax.random.split(key, 8)
    p = {}
    p["wq"], p["bq"] = linear(keys[0], DQP, ALL_HEAD)
    p["wk"], p["bk"] = linear(keys[1], HIDDEN_IN, ALL_HEAD)
    p["wv"], p["bv"] = linear(keys[2], HIDDEN_IN, ALL_HEAD)
    p["wo"], p["bo"] = linear(keys[3], HIDDEN, HIDDEN)
    p["wi"], p["bi"] = linear(keys[4], HCAT, INTER)
    p["w2"], p["b2"] = linear(keys[5], INTER, HIDDEN)
    p["g1"] = jnp.ones((1, HIDDEN), jnp.float32)
    p["be1"] = jnp.zeros((1, HIDDEN), jnp.float32)
    p["g2"] = jnp.ones((1, HIDDEN), jnp.float32)
    p["be2"] = jnp.zeros((1, HIDDEN), jnp.float32)
    return p


# ----------------------------- pure-JAX reference -----------------------------
def reference(inputs, hidden_states, query_hidden_states, p):
    q_plus = jnp.concatenate([query_hidden_states, hidden_states], axis=2)
    q = q_plus @ p["wq"] + p["bq"]
    k = inputs @ p["wk"] + p["bk"]
    v = inputs @ p["wv"] + p["bv"]

    def split(x, s):
        return x.reshape(B, s, NUM_HEADS, HEAD_SIZE).transpose(0, 2, 1, 3)

    qh, kh, vh = split(q, SQ), split(k, SKV), split(v, SKV)
    scores = jnp.einsum("bhqd,bhkd->bhqk", qh, kh) / math.sqrt(HEAD_SIZE)
    probs = jax.nn.softmax(scores, axis=-1)
    ctx = jnp.einsum("bhqk,bhkd->bhqd", probs, vh).transpose(0, 2, 1, 3).reshape(B, SQ, ALL_HEAD)

    def ln(x, g, b):
        mu = x.mean(-1, keepdims=True)
        var = ((x - mu) ** 2).mean(-1, keepdims=True)
        return (x - mu) / jnp.sqrt(var + EPS) * g + b

    h1 = ln(ctx @ p["wo"] + p["bo"] + hidden_states, p["g1"], p["be1"])
    inter = jnp.concatenate([h1, query_hidden_states], axis=2) @ p["wi"] + p["bi"]
    inter = jax.nn.gelu(inter, approximate=False)
    return ln(inter @ p["w2"] + p["b2"] + h1, p["g2"], p["be2"])


if __name__ == "__main__":
    key = jax.random.PRNGKey(0)
    k_in, k_hid, k_qhs, k_par = jax.random.split(key, 4)

    inputs = jax.random.normal(k_in, (B, SKV, HIDDEN_IN), jnp.float32)
    hidden_states = jax.random.normal(k_hid, (B, SQ, HIDDEN), jnp.float32)
    query_hidden_states = jax.random.normal(k_qhs, (B, SQ, QUERY_DIM), jnp.float32)
    params = init_params(k_par)

    packed = jax.tree_util.tree_map(jax.block_until_ready, prepare_params(params))  # one-time prep

    out = bert_reduce_add_layer(inputs, hidden_states, query_hidden_states, packed)
    out = jax.block_until_ready(out)

    ref = reference(inputs, hidden_states, query_hidden_states, params)
    assert out.shape == (B, SQ, HIDDEN)
    assert jnp.allclose(out, ref, atol=1e-4, rtol=1e-4), "mismatch vs pure-JAX reference"

    print("KERNEL_OK")
</pallas_src>

<mosaic_0001>
module attributes {stable_mosaic.version = 11 : i64} {
  func.func @bert_reduce_add_kernel(%arg0: i32, %arg1: memref<32x64xf32, #tpu.memory_space<vmem>>, %arg2: memref<16x32xf32, #tpu.memory_space<vmem>>, %arg3: memref<16x64xf32, #tpu.memory_space<vmem>>, %arg4: memref<64x160xf32, #tpu.memory_space<vmem>>, %arg5: memref<224x32xf32, #tpu.memory_space<vmem>>, %arg6: memref<112x128xf32, #tpu.memory_space<vmem>>, %arg7: memref<16x32xf32, #tpu.memory_space<vmem>>) attributes {dimension_semantics = [#tpu.dimension_semantics<arbitrary>], iteration_bounds = array<i64: 1>, scalar_prefetch = 0 : i64, scratch_operands = 0 : i64, tpu.core_type = #tpu.core_type<tc>, window_params = [{pipeline_mode = #tpu.pipeline_mode<synchronous>, transform_indices = @transform_0, window_bounds = array<i64: 32, 64>}, {pipeline_mode = #tpu.pipeline_mode<synchronous>, transform_indices = @transform_1, window_bounds = array<i64: 16, 32>}, {pipeline_mode = #tpu.pipeline_mode<synchronous>, transform_indices = @transform_2, window_bounds = array<i64: 16, 64>}, {pipeline_mode = #tpu.pipeline_mode<synchronous>, transform_indices = @transform_3, window_bounds = array<i64: 64, 160>}, {pipeline_mode = #tpu.pipeline_mode<synchronous>, transform_indices = @transform_4, window_bounds = array<i64: 224, 32>}, {pipeline_mode = #tpu.pipeline_mode<synchronous>, transform_indices = @transform_5, window_bounds = array<i64: 112, 128>}, {pipeline_mode = #tpu.pipeline_mode<synchronous>, transform_indices = @transform_6, window_bounds = array<i64: 16, 32>}]} {
    %c0 = arith.constant 0 : index
    %c0_0 = arith.constant 0 : index
    %0 = vector.load %arg1[%c0, %c0_0] : memref<32x64xf32, #tpu.memory_space<vmem>>, vector<32x64xf32>
    %c0_1 = arith.constant 0 : index
    %c0_2 = arith.constant 0 : index
    %1 = vector.load %arg2[%c0_1, %c0_2] : memref<16x32xf32, #tpu.memory_space<vmem>>, vector<16x32xf32>
    %c0_3 = arith.constant 0 : index
    %c0_4 = arith.constant 0 : index
    %2 = vector.load %arg3[%c0_3, %c0_4] : memref<16x64xf32, #tpu.memory_space<vmem>>, vector<16x64xf32>
    %c96 = arith.constant 96 : index
    %c0_5 = arith.constant 0 : index
    %3 = vector.load %arg6[%c96, %c0_5] : memref<112x128xf32, #tpu.memory_space<vmem>>, vector<9x128xf32>
    %4 = vector.extract_strided_slice %3 {offsets = [0, 0], sizes = [1, 32], strides = [1, 1]} : vector<9x128xf32> to vector<1x32xf32>
    %5 = vector.extract_strided_slice %3 {offsets = [1, 0], sizes = [1, 32], strides = [1, 1]} : vector<9x128xf32> to vector<1x32xf32>
    %6 = vector.extract_strided_slice %3 {offsets = [2, 0], sizes = [1, 32], strides = [1, 1]} : vector<9x128xf32> to vector<1x32xf32>
    %7 = vector.extract_strided_slice %3 {offsets = [3, 0], sizes = [1, 32], strides = [1, 1]} : vector<9x128xf32> to vector<1x32xf32>
    %8 = vector.extract_strided_slice %3 {offsets = [4, 0], sizes = [1, 32], strides = [1, 1]} : vector<9x128xf32> to vector<1x32xf32>
    %9 = vector.extract_strided_slice %3 {offsets = [5, 0], sizes = [1, 128], strides = [1, 1]} : vector<9x128xf32> to vector<1x128xf32>
    %10 = vector.extract_strided_slice %3 {offsets = [6, 0], sizes = [1, 32], strides = [1, 1]} : vector<9x128xf32> to vector<1x32xf32>
    %11 = vector.extract_strided_slice %3 {offsets = [7, 0], sizes = [1, 32], strides = [1, 1]} : vector<9x128xf32> to vector<1x32xf32>
    %12 = vector.extract_strided_slice %3 {offsets = [8, 0], sizes = [1, 32], strides = [1, 1]} : vector<9x128xf32> to vector<1x32xf32>
    %c0_6 = arith.constant 0 : index
    %c0_7 = arith.constant 0 : index
    %13 = vector.load %arg5[%c0_6, %c0_7] : memref<224x32xf32, #tpu.memory_space<vmem>>, vector<64x32xf32>
    %cst = arith.constant dense<0.000000e+00> : vector<16x32xf32>
    %14 = tpu.matmul %2, %13, %cst {dimension_numbers = #tpu.dot_dimension_numbers<[1], [0], [0], [1], [0, 0, 1, 1], [], []>} : vector<16x64xf32>, vector<64x32xf32>, vector<16x32xf32> -> vector<16x32xf32>
    %c64 = arith.constant 64 : index
    %c0_8 = arith.constant 0 : index
    %15 = vector.load %arg5[%c64, %c0_8] : memref<224x32xf32, #tpu.memory_space<vmem>>, vector<32x32xf32>
    %cst_9 = arith.constant dense<0.000000e+00> : vector<16x32xf32>
    %16 = tpu.matmul %1, %15, %cst_9 {dimension_numbers = #tpu.dot_dimension_numbers<[1], [0], [0], [1], [0, 0, 1, 1], [], []>} : vector<16x32xf32>, vector<32x32xf32>, vector<16x32xf32> -> vector<16x32xf32>
    %17 = arith.addf %14, %16 : vector<16x32xf32>
    %18 = vector.broadcast %4 : vector<1x32xf32> to vector<16x32xf32>
    %19 = arith.addf %17, %18 : vector<16x32xf32>
    %c0_10 = arith.constant 0 : index
    %c0_11 = arith.constant 0 : index
    %20 = vector.load %arg4[%c0_10, %c0_11] : memref<64x160xf32, #tpu.memory_space<vmem>>, vector<64x160xf32>
    %cst_12 = arith.constant dense<0.000000e+00> : vector<32x160xf32>
    %21 = tpu.matmul %0, %20, %cst_12 {dimension_numbers = #tpu.dot_dimension_numbers<[1], [0], [0], [1], [0, 0, 1, 1], [], []>} : vector<32x64xf32>, vector<64x160xf32>, vector<32x160xf32> -> vector<32x160xf32>
    %22 = vector.extract_strided_slice %21 {offsets = [0, 128], sizes = [32, 32], strides = [1, 1]} : vector<32x160xf32> to vector<32x32xf32>
    %23 = vector.broadcast %5 : vector<1x32xf32> to vector<32x32xf32>
    %24 = arith.addf %22, %23 : vector<32x32xf32>
    %25 = tpu.transpose %24, [1, 0] : vector<32x32xf32> -> vector<32x32xf32>
    %26 = vector.extract_strided_slice %19 {offsets = [0, 0], sizes = [8, 8], strides = [1, 1]} : vector<16x32xf32> to vector<8x8xf32>
    %27 = vector.extract_strided_slice %25 {offsets = [0, 0], sizes = [8, 16], strides = [1, 1]} : vector<32x32xf32> to vector<8x16xf32>
    %cst_13 = arith.constant dense<0.000000e+00> : vector<8x16xf32>
    %28 = tpu.matmul %26, %27, %cst_13 {dimension_numbers = #tpu.dot_dimension_numbers<[1], [0], [0], [1], [0, 0, 1, 1], [], []>} : vector<8x8xf32>, vector<8x16xf32>, vector<8x16xf32> -> vector<8x16xf32>
    %29 = vector.extract_strided_slice %19 {offsets = [0, 8], sizes = [8, 8], strides = [1, 1]} : vector<16x32xf32> to vector<8x8xf32>
    %30 = vector.extract_strided_slice %25 {offsets = [8, 0], sizes = [8, 16], strides = [1, 1]} : vector<32x32xf32> to vector<8x16xf32>
    %cst_14 = arith.constant dense<0.000000e+00> : vector<8x16xf32>
    %31 = tpu.matmul %29, %30, %cst_14 {dimension_numbers = #tpu.dot_dimension_numbers<[1], [0], [0], [1], [0, 0, 1, 1], [], []>} : vector<8x8xf32>, vector<8x16xf32>, vector<8x16xf32> -> vector<8x16xf32>
    %32 = vector.extract_strided_slice %19 {offsets = [0, 16], sizes = [8, 8], strides = [1, 1]} : vector<16x32xf32> to vector<8x8xf32>
    %33 = vector.extract_strided_slice %25 {offsets = [16, 0], sizes = [8, 16], strides = [1, 1]} : vector<32x32xf32> to vector<8x16xf32>
    %cst_15 = arith.constant dense<0.000000e+00> : vector<8x16xf32>
    %34 = tpu.matmul %32, %33, %cst_15 {dimension_numbers = #tpu.dot_dimension_numbers<[1], [0], [0], [1], [0, 0, 1, 1], [], []>} : vector<8x8xf32>, vector<8x16xf32>, vector<8x16xf32> -> vector<8x16xf32>
    %35 = vector.extract_strided_slice %19 {offsets = [0, 24], sizes = [8, 8], strides = [1, 1]} : vector<16x32xf32> to vector<8x8xf32>
    %36 = vector.extract_strided_slice %25 {offsets = [24, 0], sizes = [8, 16], strides = [1, 1]} : vector<32x32xf32> to vector<8x16xf32>
    %cst_16 = arith.constant dense<0.000000e+00> : vector<8x16xf32>
    %37 = tpu.matmul %35, %36, %cst_16 {dimension_numbers = #tpu.dot_dimension_numbers<[1], [0], [0], [1], [0, 0, 1, 1], [], []>} : vector<8x8xf32>, vector<8x16xf32>, vector<8x16xf32> -> vector<8x16xf32>
    %38 = vector.extract_strided_slice %19 {offsets = [8, 0], sizes = [8, 8], strides = [1, 1]} : vector<16x32xf32> to vector<8x8xf32>
    %39 = vector.extract_strided_slice %25 {offsets = [0, 16], sizes = [8, 16], strides = [1, 1]} : vector<32x32xf32> to vector<8x16xf32>
    %cst_17 = arith.constant dense<0.000000e+00> : vector<8x16xf32>
    %40 = tpu.matmul %38, %39, %cst_17 {dimension_numbers = #tpu.dot_dimension_numbers<[1], [0], [0], [1], [0, 0, 1, 1], [], []>} : vector<8x8xf32>, vector<8x16xf32>, vector<8x16xf32> -> vector<8x16xf32>
    %41 = vector.extract_strided_slice %19 {offsets = [8, 8], sizes = [8, 8], strides = [1, 1]} : vector<16x32xf32> to vector<8x8xf32>
    %42 = vector.extract_strided_slice %25 {offsets = [8, 16], sizes = [8, 16], strides = [1, 1]} : vector<32x32xf32> to vector<8x16xf32>
    %cst_18 = arith.constant dense<0.000000e+00> : vector<8x16xf32>
    %43 = tpu.matmul %41, %42, %cst_18 {dimension_numbers = #tpu.dot_dimension_numbers<[1], [0], [0], [1], [0, 0, 1, 1], [], []>} : vector<8x8xf32>, vector<8x16xf32>, vector<8x16xf32> -> vector<8x16xf32>
    %44 = vector.extract_strided_slice %19 {offsets = [8, 16], sizes = [8, 8], strides = [1, 1]} : vector<16x32xf32> to vector<8x8xf32>
    %45 = vector.extract_strided_slice %25 {offsets = [16, 16], sizes = [8, 16], strides = [1, 1]} : vector<32x32xf32> to vector<8x16xf32>
    %cst_19 = arith.constant dense<0.000000e+00> : vector<8x16xf32>
    %46 = tpu.matmul %44, %45, %cst_19 {dimension_numbers = #tpu.dot_dimension_numbers<[1], [0], [0], [1], [0, 0, 1, 1], [], []>} : vector<8x8xf32>, vector<8x16xf32>, vector<8x16xf32> -> vector<8x16xf32>
    %47 = vector.extract_strided_slice %19 {offsets = [8, 24], sizes = [8, 8], strides = [1, 1]} : vector<16x32xf32> to vector<8x8xf32>
    %48 = vector.extract_strided_slice %25 {offsets = [24, 16], sizes = [8, 16], strides = [1, 1]} : vector<32x32xf32> to vector<8x16xf32>
    %cst_20 = arith.constant dense<0.000000e+00> : vector<8x16xf32>
    %49 = tpu.matmul %47, %48, %cst_20 {dimension_numbers = #tpu.dot_dimension_numbers<[1], [0], [0], [1], [0, 0, 1, 1], [], []>} : vector<8x8xf32>, vector<8x16xf32>, vector<8x16xf32> -> vector<8x16xf32>
    %50 = tpu.concatenate %28, %31, %34, %37, %40, %43, %46, %49 in 0 : vector<8x16xf32>, vector<8x16xf32>, vector<8x16xf32>, vector<8x16xf32>, vector<8x16xf32>, vector<8x16xf32>, vector<8x16xf32>, vector<8x16xf32> -> vector<64x16xf32>
    %cst_21 = arith.constant dense<0xFF800000> : vector<64xf32>
    %51 = vector.multi_reduction <maximumf>, %50, %cst_21 [1] : vector<64x16xf32> to vector<64xf32>
    %52 = vector.shape_cast %51 : vector<64xf32> to vector<64x1xf32>
    %53 = vector.broadcast %52 : vector<64x1xf32> to vector<64x16xf32>
    %54 = arith.subf %50, %53 : vector<64x16xf32>
    %55 = math.exp %54 : vector<64x16xf32>
    %cst_22 = arith.constant dense<0.000000e+00> : vector<64xf32>
    %56 = vector.multi_reduction <add>, %55, %cst_22 [1] : vector<64x16xf32> to vector<64xf32>
    %57 = vector.shape_cast %56 : vector<64xf32> to vector<64x1xf32>
    %58 = tpu.reciprocal %57 {approx = true} : vector<64x1xf32> -> vector<64x1xf32>
    %59 = arith.mulf %57, %58 : vector<64x1xf32>
    %cst_23 = arith.constant 2.000000e+00 : f32
    %60 = vector.broadcast %cst_23 : f32 to vector<64x1xf32>
    %61 = arith.subf %60, %59 : vector<64x1xf32>
    %62 = arith.mulf %58, %61 : vector<64x1xf32>
    %63 = vector.broadcast %62 : vector<64x1xf32> to vector<64x16xf32>
    %64 = arith.mulf %55, %63 : vector<64x16xf32>
    %65 = vector.extract_strided_slice %64 {offsets = [0, 0], sizes = [8, 16], strides = [1, 1]} : vector<64x16xf32> to vector<8x16xf32>
    %66 = vector.extract_strided_slice %21 {offsets = [0, 0], sizes = [16, 32], strides = [1, 1]} : vector<32x160xf32> to vector<16x32xf32>
    %cst_24 = arith.constant dense<0.000000e+00> : vector<8x32xf32>
    %67 = tpu.matmul %65, %66, %cst_24 {dimension_numbers = #tpu.dot_dimension_numbers<[1], [0], [0], [1], [0, 0, 1, 1], [], []>} : vector<8x16xf32>, vector<16x32xf32>, vector<8x32xf32> -> vector<8x32xf32>
    %68 = vector.extract_strided_slice %64 {offsets = [8, 0], sizes = [8, 16], strides = [1, 1]} : vector<64x16xf32> to vector<8x16xf32>
    %69 = vector.extract_strided_slice %21 {offsets = [0, 32], sizes = [16, 32], strides = [1, 1]} : vector<32x160xf32> to vector<16x32xf32>
    %cst_25 = arith.constant dense<0.000000e+00> : vector<8x32xf32>
    %70 = tpu.matmul %68, %69, %cst_25 {dimension_numbers = #tpu.dot_dimension_numbers<[1], [0], [0], [1], [0, 0, 1, 1], [], []>} : vector<8x16xf32>, vector<16x32xf32>, vector<8x32xf32> -> vector<8x32xf32>
    %71 = arith.addf %67, %70 : vector<8x32xf32>
    %72 = vector.extract_strided_slice %64 {offsets = [16, 0], sizes = [8, 16], strides = [1, 1]} : vector<64x16xf32> to vector<8x16xf32>
    %73 = vector.extract_strided_slice %21 {offsets = [0, 64], sizes = [16, 32], strides = [1, 1]} : vector<32x160xf32> to vector<16x32xf32>
    %cst_26 = arith.constant dense<0.000000e+00> : vector<8x32xf32>
    %74 = tpu.matmul %72, %73, %cst_26 {dimension_numbers = #tpu.dot_dimension_numbers<[1], [0], [0], [1], [0, 0, 1, 1], [], []>} : vector<8x16xf32>, vector<16x32xf32>, vector<8x32xf32> -> vector<8x32xf32>
    %75 = arith.addf %71, %74 : vector<8x32xf32>
    %76 = vector.extract_strided_slice %64 {offsets = [24, 0], sizes = [8, 16], strides = [1, 1]} : vector<64x16xf32> to vector<8x16xf32>
    %77 = vector.extract_strided_slice %21 {offsets = [0, 96], sizes = [16, 32], strides = [1, 1]} : vector<32x160xf32> to vector<16x32xf32>
    %cst_27 = arith.constant dense<0.000000e+00> : vector<8x32xf32>
    %78 = tpu.matmul %76, %77, %cst_27 {dimension_numbers = #tpu.dot_dimension_numbers<[1], [0], [0], [1], [0, 0, 1, 1], [], []>} : vector<8x16xf32>, vector<16x32xf32>, vector<8x32xf32> -> vector<8x32xf32>
    %79 = arith.addf %75, %78 : vector<8x32xf32>
    %80 = vector.extract_strided_slice %64 {offsets = [32, 0], sizes = [8, 16], strides = [1, 1]} : vector<64x16xf32> to vector<8x16xf32>
    %81 = vector.extract_strided_slice %21 {offsets = [16, 0], sizes = [16, 32], strides = [1, 1]} : vector<32x160xf32> to vector<16x32xf32>
    %cst_28 = arith.constant dense<0.000000e+00> : vector<8x32xf32>
    %82 = tpu.matmul %80, %81, %cst_28 {dimension_numbers = #tpu.dot_dimension_numbers<[1], [0], [0], [1], [0, 0, 1, 1], [], []>} : vector<8x16xf32>, vector<16x32xf32>, vector<8x32xf32> -> vector<8x32xf32>
    %83 = vector.extract_strided_slice %64 {offsets = [40, 0], sizes = [8, 16], strides = [1, 1]} : vector<64x16xf32> to vector<8x16xf32>
    %84 = vector.extract_strided_slice %21 {offsets = [16, 32], sizes = [16, 32], strides = [1, 1]} : vector<32x160xf32> to vector<16x32xf32>
    %cst_29 = arith.constant dense<0.000000e+00> : vector<8x32xf32>
    %85 = tpu.matmul %83, %84, %cst_29 {dimension_numbers = #tpu.dot_dimension_numbers<[1], [0], [0], [1], [0, 0, 1, 1], [], []>} : vector<8x16xf32>, vector<16x32xf32>, vector<8x32xf32> -> vector<8x32xf32>
    %86 = arith.addf %82, %85 : vector<8x32xf32>
    %87 = vector.extract_strided_slice %64 {offsets = [48, 0], sizes = [8, 16], strides = [1, 1]} : vector<64x16xf32> to vector<8x16xf32>
    %88 = vector.extract_strided_slice %21 {offsets = [16, 64], sizes = [16, 32], strides = [1, 1]} : vector<32x160xf32> to vector<16x32xf32>
    %cst_30 = arith.constant dense<0.000000e+00> : vector<8x32xf32>
    %89 = tpu.matmul %87, %88, %cst_30 {dimension_numbers = #tpu.dot_dimension_numbers<[1], [0], [0], [1], [0, 0, 1, 1], [], []>} : vector<8x16xf32>, vector<16x32xf32>, vector<8x32xf32> -> vector<8x32xf32>
    %90 = arith.addf %86, %89 : vector<8x32xf32>
    %91 = vector.extract_strided_slice %64 {offsets = [56, 0], sizes = [8, 16], strides = [1, 1]} : vector<64x16xf32> to vector<8x16xf32>
    %92 = vector.extract_strided_slice %21 {offsets = [16, 96], sizes = [16, 32], strides = [1, 1]} : vector<32x160xf32> to vector<16x32xf32>
    %cst_31 = arith.constant dense<0.000000e+00> : vector<8x32xf32>
    %93 = tpu.matmul %91, %92, %cst_31 {dimension_numbers = #tpu.dot_dimension_numbers<[1], [0], [0], [1], [0, 0, 1, 1], [], []>} : vector<8x16xf32>, vector<16x32xf32>, vector<8x32xf32> -> vector<8x32xf32>
    %94 = arith.addf %90, %93 : vector<8x32xf32>
    %95 = tpu.concatenate %79, %94 in 0 : vector<8x32xf32>, vector<8x32xf32> -> vector<16x32xf32>
    %96 = vector.broadcast %6 : vector<1x32xf32> to vector<16x32xf32>
    %97 = arith.addf %95, %96 : vector<16x32xf32>
    %98 = arith.addf %97, %1 : vector<16x32xf32>
    %cst_32 = arith.constant dense<0.000000e+00> : vector<16xf32>
    %99 = vector.multi_reduction <add>, %98, %cst_32 [1] : vector<16x32xf32> to vector<16xf32>
    %100 = vector.shape_cast %99 : vector<16xf32> to vector<16x1xf32>
    %cst_33 = arith.constant 3.200000e+01 : f32
    %101 = vector.broadcast %cst_33 : f32 to vector<16x1xf32>
    %102 = arith.divf %100, %101 : vector<16x1xf32>
    %103 = vector.broadcast %102 : vector<16x1xf32> to vector<16x32xf32>
    %104 = arith.subf %98, %103 : vector<16x32xf32>
    %105 = arith.mulf %104, %104 : vector<16x32xf32>
    %cst_34 = arith.constant dense<0.000000e+00> : vector<16xf32>
    %106 = vector.multi_reduction <add>, %105, %cst_34 [1] : vector<16x32xf32> to vector<16xf32>
    %107 = vector.shape_cast %106 : vector<16xf32> to vector<16x1xf32>
    %cst_35 = arith.constant 3.200000e+01 : f32
    %108 = vector.broadcast %cst_35 : f32 to vector<16x1xf32>
    %109 = arith.divf %107, %108 : vector<16x1xf32>
    %110 = vector.broadcast %102 : vector<16x1xf32> to vector<16x32xf32>
    %111 = arith.subf %98, %110 : vector<16x32xf32>
    %cst_36 = arith.constant 9.99999996E-13 : f32
    %112 = vector.broadcast %cst_36 : f32 to vector<16x1xf32>
    %113 = arith.addf %109, %112 : vector<16x1xf32>
    %114 = math.rsqrt %113 : vector<16x1xf32>
    %115 = vector.broadcast %114 : vector<16x1xf32> to vector<16x32xf32>
    %116 = arith.mulf %111, %115 : vector<16x32xf32>
    %117 = vector.broadcast %7 : vector<1x32xf32> to vector<16x32xf32>
    %118 = arith.mulf %116, %117 : vector<16x32xf32>
    %119 = vector.broadcast %8 : vector<1x32xf32> to vector<16x32xf32>
    %120 = arith.addf %118, %119 : vector<16x32xf32>
    %c0_37 = arith.constant 0 : index
    %c0_38 = arith.constant 0 : index
    %121 = vector.load %arg6[%c0_37, %c0_38] : memref<112x128xf32, #tpu.memory_space<vmem>>, vector<32x128xf32>
    %cst_39 = arith.constant dense<0.000000e+00> : vector<16x128xf32>
    %122 = tpu.matmul %120, %121, %cst_39 {dimension_numbers = #tpu.dot_dimension_numbers<[1], [0], [0], [1], [0, 0, 1, 1], [], []>} : vector<16x32xf32>, vector<32x128xf32>, vector<16x128xf32> -> vector<16x128xf32>
    %c32 = arith.constant 32 : index
    %c0_40 = arith.constant 0 : index
    %123 = vector.load %arg6[%c32, %c0_40] : memref<112x128xf32, #tpu.memory_space<vmem>>, vector<64x128xf32>
    %cst_41 = arith.constant dense<0.000000e+00> : vector<16x128xf32>
    %124 = tpu.matmul %2, %123, %cst_41 {dimension_numbers = #tpu.dot_dimension_numbers<[1], [0], [0], [1], [0, 0, 1, 1], [], []>} : vector<16x64xf32>, vector<64x128xf32>, vector<16x128xf32> -> vector<16x128xf32>
    %125 = arith.addf %122, %124 : vector<16x128xf32>
    %126 = vector.broadcast %9 : vector<1x128xf32> to vector<16x128xf32>
    %127 = arith.addf %125, %126 : vector<16x128xf32>
    %cst_42 = arith.constant 5.000000e-01 : f32
    %128 = vector.broadcast %cst_42 : f32 to vector<16x128xf32>
    %129 = arith.mulf %128, %127 : vector<16x128xf32>
    %cst_43 = arith.constant 0.707106769 : f32
    %130 = vector.broadcast %cst_43 : f32 to vector<16x128xf32>
    %131 = arith.mulf %127, %130 : vector<16x128xf32>
    %132 = math.erf %131 : vector<16x128xf32>
    %cst_44 = arith.constant 1.000000e+00 : f32
    %133 = vector.broadcast %cst_44 : f32 to vector<16x128xf32>
    %134 = arith.addf %133, %132 : vector<16x128xf32>
    %135 = arith.mulf %129, %134 : vector<16x128xf32>
    %c96_45 = arith.constant 96 : index
    %c0_46 = arith.constant 0 : index
    %136 = vector.load %arg5[%c96_45, %c0_46] : memref<224x32xf32, #tpu.memory_space<vmem>>, vector<128x32xf32>
    %cst_47 = arith.constant dense<0.000000e+00> : vector<16x32xf32>
    %137 = tpu.matmul %135, %136, %cst_47 {dimension_numbers = #tpu.dot_dimension_numbers<[1], [0], [0], [1], [0, 0, 1, 1], [], []>} : vector<16x128xf32>, vector<128x32xf32>, vector<16x32xf32> -> vector<16x32xf32>
    %138 = vector.broadcast %10 : vector<1x32xf32> to vector<16x32xf32>
    %139 = arith.addf %137, %138 : vector<16x32xf32>
    %140 = arith.addf %139, %120 : vector<16x32xf32>
    %cst_48 = arith.constant dense<0.000000e+00> : vector<16xf32>
    %141 = vector.multi_reduction <add>, %140, %cst_48 [1] : vector<16x32xf32> to vector<16xf32>
    %142 = vector.shape_cast %141 : vector<16xf32> to vector<16x1xf32>
    %cst_49 = arith.constant 3.200000e+01 : f32
    %143 = vector.broadcast %cst_49 : f32 to vector<16x1xf32>
    %144 = arith.divf %142, %143 : vector<16x1xf32>
    %145 = vector.broadcast %144 : vector<16x1xf32> to vector<16x32xf32>
    %146 = arith.subf %140, %145 : vector<16x32xf32>
    %147 = arith.mulf %146, %146 : vector<16x32xf32>
    %cst_50 = arith.constant dense<0.000000e+00> : vector<16xf32>
    %148 = vector.multi_reduction <add>, %147, %cst_50 [1] : vector<16x32xf32> to vector<16xf32>
    %149 = vector.shape_cast %148 : vector<16xf32> to vector<16x1xf32>
    %cst_51 = arith.constant 3.200000e+01 : f32
    %150 = vector.broadcast %cst_51 : f32 to vector<16x1xf32>
    %151 = arith.divf %149, %150 : vector<16x1xf32>
    %152 = vector.broadcast %144 : vector<16x1xf32> to vector<16x32xf32>
    %153 = arith.subf %140, %152 : vector<16x32xf32>
    %cst_52 = arith.constant 9.99999996E-13 : f32
    %154 = vector.broadcast %cst_52 : f32 to vector<16x1xf32>
    %155 = arith.addf %151, %154 : vector<16x1xf32>
    %156 = math.rsqrt %155 : vector<16x1xf32>
    %157 = vector.broadcast %156 : vector<16x1xf32> to vector<16x32xf32>
    %158 = arith.mulf %153, %157 : vector<16x32xf32>
    %159 = vector.broadcast %11 : vector<1x32xf32> to vector<16x32xf32>
    %160 = arith.mulf %158, %159 : vector<16x32xf32>
    %161 = vector.broadcast %12 : vector<1x32xf32> to vector<16x32xf32>
    %162 = arith.addf %160, %161 : vector<16x32xf32>
    %c0_53 = arith.constant 0 : index
    %c0_54 = arith.constant 0 : index
    %163 = vector.load %arg7[%c0_53, %c0_54] : memref<16x32xf32, #tpu.memory_space<vmem>>, vector<16x32xf32>
    tpu.vector_store %arg7[%c0_53, %c0_54], %162 {strides = array<i32>} : memref<16x32xf32, #tpu.memory_space<vmem>>, vector<16x32xf32>,
    return
  }
  func.func @transform_0(%arg0: i32) -> (i32, i32) {
    %c0_i32 = arith.constant 0 : i32
    %c0_i32_0 = arith.constant 0 : i32
    %c0_i32_1 = arith.constant 0 : i32
    return %c0_i32, %c0_i32_0 : i32, i32
  }
  func.func @transform_1(%arg0: i32) -> (i32, i32) {
    %c0_i32 = arith.constant 0 : i32
    %c0_i32_0 = arith.constant 0 : i32
    %c0_i32_1 = arith.constant 0 : i32
    return %c0_i32, %c0_i32_0 : i32, i32
  }
  func.func @transform_2(%arg0: i32) -> (i32, i32) {
    %c0_i32 = arith.constant 0 : i32
    %c0_i32_0 = arith.constant 0 : i32
    %c0_i32_1 = arith.constant 0 : i32
    return %c0_i32, %c0_i32_0 : i32, i32
  }
  func.func @transform_3(%arg0: i32) -> (i32, i32) {
    %c0_i32 = arith.constant 0 : i32
    %c0_i32_0 = arith.constant 0 : i32
    %c0_i32_1 = arith.constant 0 : i32
    return %c0_i32, %c0_i32_0 : i32, i32
  }
  func.func @transform_4(%arg0: i32) -> (i32, i32) {
    %c0_i32 = arith.constant 0 : i32
    %c0_i32_0 = arith.constant 0 : i32
    %c0_i32_1 = arith.constant 0 : i32
    return %c0_i32, %c0_i32_0 : i32, i32
  }
  func.func @transform_5(%arg0: i32) -> (i32, i32) {
    %c0_i32 = arith.constant 0 : i32
    %c0_i32_0 = arith.constant 0 : i32
    %c0_i32_1 = arith.constant 0 : i32
    return %c0_i32, %c0_i32_0 : i32, i32
  }
  func.func @transform_6(%arg0: i32) -> (i32, i32) {
    %c0_i32 = arith.constant 0 : i32
    %c0_i32_0 = arith.constant 0 : i32
    %c0_i32_1 = arith.constant 0 : i32
    return %c0_i32, %c0_i32_0 : i32, i32
  }
}

</mosaic_0001>

<bundles_post_ra>
// kernel: bert_reduce_add_layer.1
= control target key start
LH: loop header
LB: loop body
LE: loop exit
PB: predicated region body
PF: predicated region fallthrough
CT: control target
= control target key end

     0   :  { %v2764_v7 = vmov 0.0   ;;  %vm46_vm0 = vcmask 261120   ;;  %s3265_s0 = inlined_call_operand.vmem [shape: f32[32,64], index: 0, kind: input, shape index: {}]   ;;  %s3266_s1 = inlined_call_operand.vmem [shape: f32[16,32], index: 1, kind: input, shape index: {}]   ;;  %s3267_s2 = inlined_call_operand.vmem [shape: f32[16,64], index: 2, kind: input, shape index: {}]   ;;  %s3268_s3 = inlined_call_operand.vmem [shape: f32[64,160], index: 3, kind: input, shape index: {}]   ;;  %s3269_s4 = inlined_call_operand.vmem [shape: f32[224,32], index: 4, kind: input, shape index: {}]   ;;  %s3270_s5 = inlined_call_operand.vmem [shape: f32[112,128], index: 5, kind: input, shape index: {}]   ;;  %s3271_s6 = inlined_call_operand.hbm [shape: f32[16,32], index: 6, kind: output, shape index: {}]  }
   0x1   :  { %v217_v0 = vld [vmem:[%s3268_s3 + $0x8] sm:$0xff]  ;;  %v219_v1 = vld [vmem:[%s3268_s3 + $0x18] sm:$0xff]  ;;  %v216_v2 = vld [vmem:[%s3268_s3] sm:$0xff]  ;;  %308 = vmatprep.mubr.f32.mxu1 %v2764_v7 }
   0x2   :  { %v2491_v3 = vpack.c.bf16 %v219_v1, %v217_v0  ;;  %v218_v4 = vld [vmem:[%s3268_s3 + $0x10] sm:$0xff]  ;;  %v42_v5 = vld [vmem:[%s3269_s4 + $0x40] sm:$0xff]  ;;  %v43_v6 = vld [vmem:[%s3269_s4 + $0x48] sm:$0xff] }
   0x3   :  { %v2493_v8 = vpack.c.bf16 %v218_v4, %v216_v2  ;;  %v2467_v9 = vpack.c.bf16 %v43_v6, %v42_v5  ;;  %v221_v10 = vld [vmem:[%s3268_s3 + $0x28] sm:$0xff]  ;;  %v223_v11 = vld [vmem:[%s3268_s3 + $0x38] sm:$0xff]  ;;  %v220_v12 = vld [vmem:[%s3268_s3 + $0x20] sm:$0xff] }
   0x4   :  { %2492 = vmatprep.subr.bf16.mxu1 %v2491_v3  ;;  %v2495_v13 = vpack.c.bf16 %v223_v11, %v221_v10  ;;  %v222_v14 = vld [vmem:[%s3268_s3 + $0x30] sm:$0xff]  ;;  %v45_v16 = vld [vmem:[%s3269_s4 + $0x58] sm:$0xff]  ;;  %v225_v19 = vld [vmem:[%s3268_s3 + $0x48] sm:$0xff] }
   0x5   :  { %v44_v15 = vld [vmem:[%s3269_s4 + $0x50] sm:$0xff]  ;;  %2494 = vmatpush1.bf16.msra.mxu1 %v2493_v8  ;;  %2468 = vmatprep.subr.bf16.mxu0 %v2467_v9  ;;  %v2497_v17 = vpack.c.bf16 %v222_v14, %v220_v12  ;;  %v227_v20 = vld [vmem:[%s3268_s3 + $0x58] sm:$0xff]  ;;  %v224_v21 = vld [vmem:[%s3268_s3 + $0x40] sm:$0xff] }
   0x6   :  { %v2471_v18 = vpack.c.bf16 %v45_v16, %v44_v15  ;;  %2470 = vmatpush3.bf16.msra.mxu0 %v2467_v9  ;;  %2496 = vmatprep.subr.bf16.mxu1 %v2495_v13  ;;  %v2499_v22 = vpack.c.bf16 %v227_v20, %v225_v19  ;;  %v226_v23 = vld [vmem:[%s3268_s3 + $0x50] sm:$0xff]  ;;  %v2863_v24 = vld [vmem:[%s3266_s1] sm:$0xff]  ;;  %v35_v26 = vld [vmem:[%s3269_s4 + $0x8] sm:$0xff] }
   0x7   :  { %v34_v25 = vld [vmem:[%s3269_s4] sm:$0xff]  ;;  %2268 = vmatprep.mubr.msk.f32.mxu0 %vm46_vm0, %v2863_v24  ;;  %v229_v27 = vld [vmem:[%s3268_s3 + $0x68] sm:$0xff]  ;;  %v231_v29 = vld [vmem:[%s3268_s3 + $0x78] sm:$0xff]  ;;  %v2501_v30 = vpack.c.bf16 %v226_v23, %v224_v21 }
   0x8   :  { %2472 = vmatprep.subr.bf16.mxu0 %v2471_v18  ;;  %v2475_v28 = vpack.c.bf16 %v35_v26, %v34_v25  ;;  %v36_v31 = vld [vmem:[%s3269_s4 + $0x10] sm:$0xff]  ;;  %v37_v32 = vld [vmem:[%s3269_s4 + $0x18] sm:$0xff]  ;;  %v2888_v33 = vld [vmem:[%s3266_s1 + $0x8] sm:$0xff]  ;;  %v2503_v34 = vpack.c.bf16 %v231_v29, %v229_v27 }
   0x9   :  { %2498 = vmatpush1.bf16.msra.mxu1 %v2497_v17  ;;  %v228_v35 = vld [vmem:[%s3268_s3 + $0x60] sm:$0xff]  ;;  %v230_v36 = vld [vmem:[%s3268_s3 + $0x70] sm:$0xff]  ;;  %v2479_v37 = vpack.c.bf16 %v37_v32, %v36_v31  ;;  %v39_v39 = vld [vmem:[%s3269_s4 + $0x28] sm:$0xff] }
   0xa   :  { %2474 = vmatpush3.bf16.msra.mxu0 %v2471_v18  ;;  %2500 = vmatprep.subr.bf16.mxu1 %v2499_v22  ;;  %v38_v38 = vld [vmem:[%s3269_s4 + $0x20] sm:$0xff]  ;;  %v2505_v41 = vpack.c.bf16 %v230_v36, %v228_v35 }
   0xb   :  { %2476 = vmatprep.subr.bf16.mxu0 %v2475_v28  ;;  %v2905_v40 = vld [vmem:[%s3267_s2] sm:$0xff] }
   0xd   :  { %2502 = vmatpush1.bf16.msra.mxu1 %v2501_v30  ;;  %2269 = vmatmul.mubr.msk.f32.vlgmr.msra.gmra.mrb[0].mxu0 %vm46_vm0, %v2888_v33 }
   0xe   :  { %11 = vsyncpa [#allocation3], 0  ;;  %2478 = vmatpush3.bf16.msra.mxu0 %v2475_v28  ;;  %2504 = vmatprep.subr.bf16.mxu1 %v2503_v34  ;;  %vm128_vm1 = vcmask 523264   ;;  %v2483_v42 = vpack.c.bf16 %v39_v39, %v38_v38  ;;  %v40_v43 = vld [vmem:[%s3269_s4 + $0x30] sm:$0xff]  ;;  %v41_v44 = vld [vmem:[%s3269_s4 + $0x38] sm:$0xff]  ;;  %v2765_v51 = vmov 0.0|0.0   ;;  %v210_v52 = vlaneseq }
   0xf   :  { %2480 = vmatprep.subr.bf16.mxu0 %v2479_v37  ;;  %2287 = vmatprep.mubr.msk.f32.mxu0 %vm128_vm1, %v2905_v40  ;;  %v24_v45 = vld [vmem:[%s3265_s0] sm:$0xff]  ;;  %v2487_v46 = vpack.c.bf16 %v41_v44, %v40_v43  ;;  %v25_v47 = vld [vmem:[%s3265_s0 + $0x8] sm:$0xff]  ;;  %v26_v48 = vld [vmem:[%s3265_s0 + $0x10] sm:$0xff]  ;;  %vm2766_vm2 = vmmov 0   ;;  %vm341_vm3 = vcmask 64512   ;;  %s2767_s19 = smov 104  }
  0x10   :  { %v2933_v49 = vld [vmem:[%s3267_s2 + $0x8] sm:$0xff]  ;;  %v27_v50 = vld [vmem:[%s3265_s0 + $0x18] sm:$0xff]  ;;  %v2949_v53 = vshrl.u32 %v210_v52, 7  ;;  %v2955_v55 = vld [vmem:[%s3270_s5 + $0x60] sm:$0xff]  ;;  %s2768_s20 = smov 120   ;;  %s2769_s21 = smov 112  }
  0x11   :  { %2506 = vmatpush1.bf16.msra.mxu1 %v2505_v41  ;;  %vm2974_vm4 = vmpackc.low %vm341_vm3, %vm341_vm3  ;;  %vm992_vm5 = vcmask 130048   ;;  %s2770_s22 = smov 96   ;;  %s2771_s23 = smov 32  }
  0x12   :  { %2482 = vmatpush3.bf16.msra.mxu0 %v2479_v37  ;;  %2511 = vmatprep.subr.bf16.mxu1 %v2765_v51  ;;  %v335_v54 = vsub.s32 1, %v2949_v53  ;;  %v212_v59 = vsub.s32 0, %v2949_v53  ;;  %s2772_s24 = smov 64   ;;  %s2773_s28 = smov [#allocation2]  }
  0x13   :  { %2484 = vmatprep.subr.bf16.mxu0 %v2483_v42  ;;  %s2106_s1 = sshll.u32 %s2773_s28, 4  ;;  %s2107_s1 = int_to_ptr.vmem [resolvable:$true] %s2106_s1 }
  0x14   :  { %2121 = vmatmul.mubr.msk.f32.vlgmr.msra.gmra.mrb[0].mxu1 %vm128_vm1, %v24_v45  ;;  %v336_v58 = vrot.slane %v2955_v55, %v335_v54  ;;  %v213_v2 = vrot.slane %v2955_v55, %v212_v59  ;;  %s2740_s29 = scalar_lea.vmem %s2107_s1, 256  ;;  %p2745_p1 = scmp.lt.s32.totalorder %s2107_s1, %s2107_s1 }
  0x15   :  { %314 = vmatprep.mubr.f32.mxu1 %v2764_v7  ;;  %p2741_p0 = scmp.ne.s32.totalorder %s2107_s1, %s2740_s29  ;;  %p2746_p2 = scmp.lt.s32.totalorder %s2740_s29, %s2740_s29 }
  0x16   :  { %2486 = vmatpush3.bf16.msra.mxu0 %v2483_v42 }
  0x17   :  { %2488 = vmatprep.subr.bf16.mxu0 %v2487_v46  ;;  %p2747_p3 = por %p2746_p2, %p2745_p1 }
  0x18   :  { %2122 = vmatmul.mubr.msk.f32.gmra.mrb[2].mxu1 %vm128_vm1, %v25_v47 }
  0x19   :  { %320 = vmatprep.mubr.f32.mxu1 %v2764_v7  ;;  %p2748_p4 = pnand %p2747_p3, %p2741_p0 }
  0x1a   :  { %2490 = vmatpush3.bf16.msra.mxu0 %v2487_v46 }
  0x1b   :  { %2507 = vmatprep.subr.bf16.mxu0 %v2765_v51 }
  0x1c   :  { %2123 = vmatmul.mubr.msk.f32.gmra.mrb[4].mxu1 %vm128_vm1, %v26_v48 }
  0x1d   :  { %2288 = vmatmul.mubr.msk.f32.vlgmr.msra.gmra.mrb[0].mxu0 %vm128_vm1, %v2933_v49  ;;  %326 = vmatprep.mubr.f32.mxu1 %v2764_v7 }
  0x1e   :  { %2294 = vmatprep.mubr.msk.f32.mxu0 %vm2766_vm2, %v2764_v7 }
  0x20   :  { %2124 = vmatmul.mubr.msk.f32.gmra.mrb[6].mxu1 %vm128_vm1, %v27_v50 }
  0x21   :  { %2301 = vmatprep.mubr.msk.f32.mxu1 %vm2766_vm2, %v2764_v7 }
  0xe7   :  { %v2957_v56 = vpop.f32.mrb[0].mxu1 }
  0xe8   :  { %v312_v57 = vpop.f32.mrb[1].mxu1 }
  0xe9   :  { %v337_v0 = vadd.f32 %v336_v58, %v312_v57 }
  0xeb   :  { %v2961_v60 = vpop.f32.mrb[2].mxu1 }
  0xec   :  { %v2543_v61 = vpack.c.bf16 %v2961_v60, %v2957_v56  ;;  %v318_v62 = vpop.f32.mrb[3].mxu1  ;;  %v2967_v63 = vpack.i.bf16 %v2961_v60, %v2957_v56 }
  0xed   :  { %v338_v1 = vadd.f32 %v336_v58, %v318_v62 }
  0xef   :  { %v2508_v3 = vpack.c.bf16 %v338_v1, %v337_v0  ;;  %v2645_v4 = vpack.i.bf16 %v338_v1, %v337_v0  ;;  %v2970_v5 = vpop.f32.mrb[4].mxu1 }
  0xf0   :  { %v2289_v8 = vpop.f32.mrb[0].mxu0  ;;  %v324_v9 = vpop.f32.mrb[5].mxu1 }
  0xf1   :  { %2646 = vrot.lane.b32.xlu1 %v2645_v4, %s2767_s19  ;;  %2636 = vrot.lane.b32.xlu0 %v2645_v4, %s2768_s20  ;;  %v201_v10 = vpop.f32.mrb[1].mxu0  ;;  %v339_v12 = vadd.f32 %v336_v58, %v324_v9  ;;  %v215_v20 = vadd.f32 %v2289_v8, %v213_v2 }
  0xf2   :  { %2510 = vmatpush3.bf16.xpose.msk.msra.mxu0 %vm2974_vm4, %v2508_v3  ;;  %v214_v11 = vadd.f32 %v213_v2, %v201_v10 }
  0xf3   :  { %v2980_v13 = vpop.f32.mrb[6].mxu1  ;;  %2515 = vmatprep.subr.bf16.mxu0 %v2765_v51 }
  0xf4   :  { %v2555_v14 = vpack.c.bf16 %v2980_v13, %v2970_v5  ;;  %v330_v15 = vpop.f32.mrb[7].mxu1  ;;  %v2987_v16 = vpack.i.bf16 %v2980_v13, %v2970_v5 }
  0xf5   :  { %v340_v17 = vadd.f32 %v336_v58, %v330_v15  ;;  %421 = vrot.lane.b32.xlu1 %v214_v11, %s2768_s20  ;;  %2641 = vrot.lane.b32.xlu0 %v2645_v4, %s2769_s21 }
  0xf7   :  { %v2524_v18 = vpack.c.bf16 %v340_v17, %v339_v12  ;;  %v2650_v19 = vpack.i.bf16 %v340_v17, %v339_v12 }
  0xf9   :  { %2295 = vmatmul.mubr.msk.f32.vlgmr.msra.gmra.mrb[2].mxu0 %vm341_vm3, %v214_v11  ;;  %503 = vrot.lane.b32.xlu0 %v214_v11, %s2769_s21 }
  0xfa   :  { %2651 = vrot.lane.b32.xlu1 %v2650_v19, %s2768_s20  ;;  %2308 = vmatprep.mubr.msk.f32.mxu0 %vm2766_vm2, %v2764_v7 }
  0xfd   :  { %585 = vrot.lane.b32.xlu0 %v214_v11, %s2767_s19 }
  0xfe   :  { %2656 = vrot.lane.b32.xlu1 %v2650_v19, %s2769_s21 }
 0x101   :  { %2661 = vrot.lane.b32.xlu0 %v2650_v19, %s2767_s19 }
 0x102   :  { %746 = vrot.lane.b32.xlu1 %v215_v20, %s2768_s20 }
 0x105   :  { %828 = vrot.lane.b32.xlu0 %v215_v20, %s2769_s21 }
 0x106   :  { %910 = vrot.lane.b32.xlu1 %v215_v20, %s2767_s19 }
 0x163   :  { %v2647_v21 = vpop.permute.xlu1 %2646  ;;  %v2637_v22 = vpop.permute.xlu0 %2636 }
 0x164   :  { %v2639_v23 = vunpack.i.h.bf16 %v2637_v22  ;;  %v2638_v25 = vunpack.i.l.bf16 %v2637_v22  ;;  %v2649_v31 = vunpack.i.h.bf16 %v2647_v21  ;;  %v2648_v32 = vunpack.i.l.bf16 %v2647_v21 }
 0x166   :  { %v2512_v26 = vpack.c.bf16 %v2639_v23, %v2638_v25  ;;  %v2520_v37 = vpack.c.bf16 %v2649_v31, %v2648_v32 }
 0x167   :  { %v422_v27 = vpop.permute.xlu1 %421  ;;  %v2642_v28 = vpop.permute.xlu0 %2641 }
 0x168   :  { %v2644_v29 = vunpack.i.h.bf16 %v2642_v28  ;;  %v2643_v30 = vunpack.i.l.bf16 %v2642_v28  ;;  %2514 = vmatpush3.bf16.xpose.msk.msra.mxu1 %vm2974_vm4, %v2512_v26 }
 0x169   :  { %2519 = vmatprep.subr.bf16.mxu1 %v2765_v51 }
 0x16a   :  { %v2516_v34 = vpack.c.bf16 %v2644_v29, %v2643_v30 }
 0x16b   :  { %v504_v35 = vpop.permute.xlu0 %503 }
 0x16c   :  { %2518 = vmatpush3.bf16.xpose.msk.msra.mxu0 %vm2974_vm4, %v2516_v34  ;;  %v2652_v36 = vpop.permute.xlu1 %2651 }
 0x16d   :  { %2523 = vmatprep.subr.bf16.mxu0 %v2765_v51  ;;  %v2654_v39 = vunpack.i.h.bf16 %v2652_v36  ;;  %v2653_v41 = vunpack.i.l.bf16 %v2652_v36 }
 0x16f   :  { %2302 = vmatmul.mubr.msk.f32.vlgmr.msra.gmra.mrb[8].mxu1 %vm341_vm3, %v422_v27  ;;  %v586_v38 = vpop.permute.xlu0 %585  ;;  %v2528_v43 = vpack.c.bf16 %v2654_v39, %v2653_v41 }
 0x170   :  { %2522 = vmatpush3.bf16.xpose.msk.msra.mxu1 %vm2974_vm4, %v2520_v37  ;;  %2315 = vmatprep.mubr.msk.f32.mxu1 %vm2766_vm2, %v2764_v7  ;;  %v2657_v42 = vpop.permute.xlu1 %2656 }
 0x171   :  { %2527 = vmatprep.subr.bf16.mxu1 %v2765_v51  ;;  %v2659_v44 = vunpack.i.h.bf16 %v2657_v42  ;;  %v2658_v45 = vunpack.i.l.bf16 %v2657_v42 }
 0x173   :  { %2309 = vmatmul.mubr.msk.f32.vlgmr.msra.gmra.mrb[4].mxu0 %vm341_vm3, %v504_v35  ;;  %v2662_v46 = vpop.permute.xlu0 %2661  ;;  %v2532_v47 = vpack.c.bf16 %v2659_v44, %v2658_v45 }
 0x174   :  { %2526 = vmatpush3.bf16.xpose.msk.msra.mxu0 %vm2974_vm4, %v2524_v18  ;;  %2322 = vmatprep.mubr.msk.f32.mxu0 %vm2766_vm2, %v2764_v7  ;;  %v2664_v48 = vunpack.i.h.bf16 %v2662_v46  ;;  %v2663_v50 = vunpack.i.l.bf16 %v2662_v46  ;;  %v747_v54 = vpop.permute.xlu1 %746 }
 0x175   :  { %2531 = vmatprep.subr.bf16.mxu0 %v2765_v51 }
 0x176   :  { %v2536_v52 = vpack.c.bf16 %v2664_v48, %v2663_v50 }
 0x177   :  { %2316 = vmatmul.mubr.msk.f32.vlgmr.msra.gmra.mrb[10].mxu1 %vm341_vm3, %v586_v38  ;;  %v829_v57 = vpop.permute.xlu0 %828 }
 0x178   :  { %2530 = vmatpush3.bf16.xpose.msk.msra.mxu1 %vm2974_vm4, %v2528_v43  ;;  %2329 = vmatprep.mubr.msk.f32.mxu1 %vm2766_vm2, %v2764_v7  ;;  %v911_v58 = vpop.permute.xlu1 %910 }
 0x179   :  { %2535 = vmatprep.subr.bf16.mxu1 %v2765_v51 }
 0x17b   :  { %2323 = vmatmul.mubr.msk.f32.vlgmr.msra.gmra.mrb[6].mxu0 %vm341_vm3, %v215_v20 }
 0x17c   :  { %2534 = vmatpush3.bf16.xpose.msk.msra.mxu0 %vm2974_vm4, %v2532_v47  ;;  %2336 = vmatprep.mubr.msk.f32.mxu0 %vm2766_vm2, %v2764_v7 }
 0x17d   :  { %2539 = vmatprep.subr.bf16.mxu0 %v2765_v51 }
 0x17f   :  { %2330 = vmatmul.mubr.msk.f32.vlgmr.msra.gmra.mrb[12].mxu1 %vm341_vm3, %v747_v54 }
 0x180   :  { %2538 = vmatpush3.bf16.xpose.msk.msra.mxu1 %vm2974_vm4, %v2536_v52  ;;  %2343 = vmatprep.mubr.msk.f32.mxu1 %vm2766_vm2, %v2764_v7 }
 0x181   :  { %2548 = vmatprep.subr.bf16.mxu1 %v2765_v51 }
 0x183   :  { %2337 = vmatmul.mubr.msk.f32.vlgmr.msra.gmra.mrb[8].mxu0 %vm341_vm3, %v829_v57 }
 0x184   :  { %2350 = vmatprep.mubr.msk.f32.mxu0 %vm2766_vm2, %v2764_v7 }
 0x187   :  { %2344 = vmatmul.mubr.msk.f32.vlgmr.msra.gmra.mrb[14].mxu1 %vm341_vm3, %v911_v58 }
 0x188   :  { %2371 = vmatprep.mubr.msk.f32.mxu1 %vm2766_vm2, %v2764_v7 }
 0x1cc   :  { %v417_v59 = vpop.f32.mrb[2].mxu0 }
 0x1cd   :  { %v2296_v62 = vpop.f32.mrb[3].mxu0  ;;  %v993_v0 = vsel %vm992_vm5, %v417_v59, -inf }
 0x1ce   :  { %994 = vmax.xlane.f32.xlu1 %v993_v0 }
 0x242   :  { %v499_v1 = vpop.f32.mrb[8].mxu1 }
 0x243   :  { %v2303_v2 = vpop.f32.mrb[9].mxu1  ;;  %v996_v3 = vsel %vm992_vm5, %v499_v1, -inf }
 0x244   :  { %997 = vmax.xlane.f32.xlu0 %v996_v3 }
 0x246   :  { %v581_v4 = vpop.f32.mrb[4].mxu0 }
 0x247   :  { %v2310_v6 = vpop.f32.mrb[5].mxu0  ;;  %v999_v8 = vsel %vm992_vm5, %v581_v4, -inf }
 0x248   :  { %1000 = vmax.xlane.f32.xlu0 %v999_v8 }
 0x24a   :  { %v663_v9 = vpop.f32.mrb[10].mxu1 }
 0x24b   :  { %v2317_v10 = vpop.f32.mrb[11].mxu1  ;;  %v1002_v11 = vsel %vm992_vm5, %v663_v9, -inf }
 0x24c   :  { %1003 = vmax.xlane.f32.xlu0 %v1002_v11 }
 0x24e   :  { %v742_v12 = vpop.f32.mrb[6].mxu0 }
 0x24f   :  { %v2324_v15 = vpop.f32.mrb[7].mxu0  ;;  %v1005_v17 = vsel %vm992_vm5, %v742_v12, -inf }
 0x250   :  { %1006 = vmax.xlane.f32.xlu0 %v1005_v17 }
 0x252   :  { %v824_v18 = vpop.f32.mrb[12].mxu1 }
 0x253   :  { %v2331_v19 = vpop.f32.mrb[13].mxu1  ;;  %v1008_v20 = vsel %vm992_vm5, %v824_v18, -inf }
 0x254   :  { %1009 = vmax.xlane.f32.xlu1 %v1008_v20 }
 0x256   :  { %v906_v21 = vpop.f32.mrb[8].mxu0 }
 0x257   :  { %v2338_v22 = vpop.f32.mrb[9].mxu0  ;;  %v1011_v23 = vsel %vm992_vm5, %v906_v21, -inf }
 0x258   :  { %1012 = vmax.xlane.f32.xlu1 %v1011_v23 }
 0x25a   :  { %v988_v25 = vpop.f32.mrb[14].mxu1 }
 0x25b   :  { %v2345_v26 = vpop.f32.mrb[15].mxu1  ;;  %v1014_v27 = vsel %vm992_vm5, %v988_v25, -inf  ;;  %v995_v28 = vpop.xlane.xlu1 %994 }
 0x25c   :  { %1015 = vmax.xlane.f32.xlu0 %v1014_v27  ;;  %v1017_v29 = vsub.f32 %v417_v59, %v995_v28 }
 0x25e   :  { %v1025_v30 = vmul.f32 1.442695, %v1017_v29 }
 0x260   :  { %2695 = vpow2.f32 %v1025_v30 }
 0x269   :  { %2666 = vrot.lane.b32.xlu1 %v2967_v63, %s2770_s22 }
 0x26a   :  { %v3048_v31 = vpop.eup %2695 }
 0x26b   :  { %v1041_v32 = vsel %vm992_vm5, %v3048_v31, 0.0 }
 0x26d   :  { %2676 = vrot.lane.b32.xlu1 %v2967_v63, %s2771_s23 }
 0x271   :  { %2681 = vrot.lane.b32.xlu1 %v2987_v16, %s2770_s22 }
 0x272   :  { %2671 = vrot.lane.b32.xlu0 %v2967_v63, %s2772_s24 }
 0x291   :  { %1042 = vadd.xlane.f32.xlu0 %v1041_v32 }
 0x2d1   :  { %v998_v34 = vpop.xlane.xlu0 %997 }
 0x2d2   :  { %v1018_v35 = vsub.f32 %v499_v1, %v998_v34 }
 0x2d4   :  { %v1027_v36 = vmul.f32 1.442695, %v1018_v35 }
 0x2d5   :  { %v1001_v37 = vpop.xlane.xlu0 %1000 }
 0x2d6   :  { %2697 = vpow2.f32 %v1027_v36  ;;  %v1019_v38 = vsub.f32 %v581_v4, %v1001_v37 }
 0x2d8   :  { %v1029_v39 = vmul.f32 1.442695, %v1019_v38 }
 0x2d9   :  { %v1004_v41 = vpop.xlane.xlu0 %1003 }
 0x2da   :  { %2699 = vpow2.f32 %v1029_v39  ;;  %v1020_v63 = vsub.f32 %v663_v9, %v1004_v41 }
 0x2dc   :  { %v1031_v42 = vmul.f32 1.442695, %v1020_v63 }
 0x2dd   :  { %v1007_v43 = vpop.xlane.xlu0 %1006 }
 0x2de   :  { %2701 = vpow2.f32 %v1031_v42  ;;  %v1021_v44 = vsub.f32 %v742_v12, %v1007_v43 }
 0x2e0   :  { %v3052_v45 = vpop.eup %2697  ;;  %v1033_v46 = vmul.f32 1.442695, %v1021_v44 }
 0x2e1   :  { %v1010_v47 = vpop.xlane.xlu1 %1009  ;;  %v1044_v48 = vsel %vm992_vm5, %v3052_v45, 0.0 }
 0x2e2   :  { %2703 = vpow2.f32 %v1033_v46  ;;  %v1022_v50 = vsub.f32 %v824_v18, %v1010_v47  ;;  %1045 = vadd.xlane.f32.xlu1 %v1044_v48 }
 0x2e4   :  { %v3056_v52 = vpop.eup %2699  ;;  %v1035_v54 = vmul.f32 1.442695, %v1022_v50 }
 0x2e5   :  { %v1013_v57 = vpop.xlane.xlu1 %1012  ;;  %v1047_v58 = vsel %vm992_vm5, %v3056_v52, 0.0 }
 0x2e6   :  { %2705 = vpow2.f32 %v1035_v54  ;;  %v1023_v59 = vsub.f32 %v906_v21, %v1013_v57  ;;  %1048 = vadd.xlane.f32.xlu1 %v1047_v58 }
 0x2e8   :  { %v3060_v62 = vpop.eup %2701  ;;  %v1037_v0 = vmul.f32 1.442695, %v1023_v59 }
 0x2e9   :  { %v1016_v1 = vpop.xlane.xlu0 %1015  ;;  %v2667_v2 = vpop.permute.xlu1 %2666  ;;  %v1050_v3 = vsel %vm992_vm5, %v3060_v62, 0.0 }
 0x2ea   :  { %2707 = vpow2.f32 %v1037_v0  ;;  %v1024_v4 = vsub.f32 %v988_v25, %v1016_v1  ;;  %v2669_v6 = vunpack.i.h.bf16 %v2667_v2  ;;  %v2668_v8 = vunpack.i.l.bf16 %v2667_v2  ;;  %1051 = vadd.xlane.f32.xlu0 %v1050_v3 }
 0x2ec   :  { %v3064_v9 = vpop.eup %2703  ;;  %v1039_v10 = vmul.f32 1.442695, %v1024_v4  ;;  %v2540_v11 = vpack.c.bf16 %v2669_v6, %v2668_v8 }
 0x2ed   :  { %v2677_v12 = vpop.permute.xlu1 %2676  ;;  %v1053_v15 = vsel %vm992_vm5, %v3064_v9, 0.0  ;;  %v2672_v27 = vpop.permute.xlu0 %2671 }
 0x2ee   :  { %2709 = vpow2.f32 %v1039_v10  ;;  %v2679_v17 = vunpack.i.h.bf16 %v2677_v12  ;;  %1054 = vadd.xlane.f32.xlu0 %v1053_v15  ;;  %2541 = vmatpush3.bf16.msra.mxu0 %v2540_v11  ;;  %v2678_v18 = vunpack.i.l.bf16 %v2677_v12  ;;  %v2674_v54 = vunpack.i.h.bf16 %v2672_v27 }
 0x2ef   :  { %2542 = vmatprep.subr.bf16.mxu0 %v2765_v51  ;;  %v2673_v57 = vunpack.i.l.bf16 %v2672_v27 }
 0x2f0   :  { %v3069_v19 = vpop.eup %2705  ;;  %v2549_v20 = vpack.c.bf16 %v2679_v17, %v2678_v18 }
 0x2f1   :  { %v1056_v21 = vsel %vm992_vm5, %v3069_v19, 0.0  ;;  %v2682_v29 = vpop.permute.xlu1 %2681  ;;  %v2546_v3 = vpack.c.bf16 %v2674_v54, %v2673_v57 }
 0x2f2   :  { %1057 = vadd.xlane.f32.xlu1 %v1056_v21  ;;  %2550 = vmatpush3.bf16.msra.mxu1 %v2549_v20  ;;  %v2684_v4 = vunpack.i.h.bf16 %v2682_v29  ;;  %v2683_v6 = vunpack.i.l.bf16 %v2682_v29 }
 0x2f3   :  { %2554 = vmatprep.subr.bf16.mxu1 %v2765_v51 }
 0x2f4   :  { %v3073_v22 = vpop.eup %2707  ;;  %v2552_v15 = vpack.c.bf16 %v2684_v4, %v2683_v6 }
 0x2f5   :  { %v1059_v23 = vsel %vm992_vm5, %v3073_v22, 0.0 }
 0x2f6   :  { %1060 = vadd.xlane.f32.xlu1 %v1059_v23 }
 0x2f8   :  { %v3078_v25 = vpop.eup %2709 }
 0x2f9   :  { %v1062_v26 = vsel %vm992_vm5, %v3078_v25, 0.0 }
 0x2fa   :  { %1063 = vadd.xlane.f32.xlu0 %v1062_v26 }
 0x307   :  { %2691 = vrot.lane.b32.xlu1 %v2987_v16, %s2771_s23 }
 0x310   :  { %2686 = vrot.lane.b32.xlu0 %v2987_v16, %s2772_s24 }
 0x31e   :  { %v1043_v28 = vpop.xlane.xlu0 %1042 }
 0x31f   :  { %2711 = vrcp.f32 %v1043_v28 }
 0x329   :  { %v2712_v34 = vpop.eup %2711 }
 0x32a   :  { %v1073_v36 = vmul.f32 %v2712_v34, %v1043_v28 }
 0x32c   :  { %v1081_v41 = vsub.f32 2.0, %v1073_v36 }
 0x32e   :  { %v1089_v46 = vmul.f32 %v2712_v34, %v1081_v41 }
 0x330   :  { %v1097_v0 = vmul.f32 %v3048_v31, %v1089_v46 }
 0x36f   :  { %v1046_v30 = vpop.xlane.xlu1 %1045 }
 0x370   :  { %2713 = vrcp.f32 %v1046_v30 }
 0x373   :  { %v1049_v32 = vpop.xlane.xlu1 %1048 }
 0x374   :  { %2715 = vrcp.f32 %v1049_v32 }
 0x377   :  { %v1052_v35 = vpop.xlane.xlu0 %1051 }
 0x378   :  { %2717 = vrcp.f32 %v1052_v35 }
 0x37a   :  { %v2714_v37 = vpop.eup %2713 }
 0x37b   :  { %v1074_v38 = vmul.f32 %v2714_v37, %v1046_v30  ;;  %v1055_v39 = vpop.xlane.xlu0 %1054 }
 0x37c   :  { %2719 = vrcp.f32 %v1055_v39 }
 0x37d   :  { %v1082_v63 = vsub.f32 2.0, %v1074_v38 }
 0x37e   :  { %v2716_v42 = vpop.eup %2715 }
 0x37f   :  { %v1090_v16 = vmul.f32 %v2714_v37, %v1082_v63  ;;  %v1075_v43 = vmul.f32 %v2716_v42, %v1049_v32  ;;  %v1058_v44 = vpop.xlane.xlu1 %1057 }
 0x380   :  { %2721 = vrcp.f32 %v1058_v44 }
 0x381   :  { %v1098_v47 = vmul.f32 %v3052_v45, %v1090_v16  ;;  %v1083_v48 = vsub.f32 2.0, %v1075_v43 }
 0x382   :  { %v2718_v50 = vpop.eup %2717 }
 0x383   :  { %v1076_v58 = vmul.f32 %v2718_v50, %v1052_v35  ;;  %v1061_v59 = vpop.xlane.xlu1 %1060  ;;  %2351 = vmatmul.mubr.msk.f32.vlgmr.msra.gmra.mrb[10].mxu0 %vm992_vm5, %v1098_v47  ;;  %v1091_v1 = vmul.f32 %v2716_v42, %v1083_v48 }
 0x384   :  { %2723 = vrcp.f32 %v1061_v59  ;;  %2544 = vmatpush3.bf16.msra.mxu0 %v2543_v61  ;;  %2357 = vmatprep.mubr.msk.f32.mxu0 %vm2766_vm2, %v2764_v7 }
 0x385   :  { %v1084_v45 = vsub.f32 2.0, %v1076_v58  ;;  %2545 = vmatprep.subr.bf16.mxu0 %v2765_v51  ;;  %v1099_v56 = vmul.f32 %v3056_v52, %v1091_v1 }
 0x386   :  { %v2720_v2 = vpop.eup %2719 }
 0x387   :  { %v1092_v8 = vmul.f32 %v2718_v50, %v1084_v45  ;;  %v1077_v10 = vmul.f32 %v2720_v2, %v1055_v39  ;;  %v1064_v11 = vpop.xlane.xlu0 %1063  ;;  %v2692_v12 = vpop.permute.xlu1 %2691  ;;  %2358 = vmatmul.mubr.msk.f32.vlgmr.msra.gmra.mrb[12].mxu0 %vm992_vm5, %v1097_v0 }
 0x388   :  { %2725 = vrcp.f32 %v1064_v11  ;;  %2547 = vmatpush3.bf16.msra.mxu0 %v2546_v3  ;;  %2364 = vmatprep.mubr.msk.f32.mxu0 %vm2766_vm2, %v2764_v7  ;;  %v2694_v17 = vunpack.i.h.bf16 %v2692_v12  ;;  %v2693_v18 = vunpack.i.l.bf16 %v2692_v12 }
 0x389   :  { %v1100_v60 = vmul.f32 %v3060_v62, %v1092_v8  ;;  %v1085_v61 = vsub.f32 2.0, %v1077_v10  ;;  %2551 = vmatprep.subr.bf16.mxu0 %v2765_v51 }
 0x38a   :  { %v2722_v31 = vpop.eup %2721  ;;  %v2561_v27 = vpack.c.bf16 %v2694_v17, %v2693_v18 }
 0x38b   :  { %v1093_v20 = vmul.f32 %v2720_v2, %v1085_v61  ;;  %v1078_v21 = vmul.f32 %v2722_v31, %v1058_v44  ;;  %v2687_v23 = vpop.permute.xlu0 %2686  ;;  %2365 = vmatmul.mubr.msk.f32.vlgmr.msra.gmra.mrb[14].mxu0 %vm992_vm5, %v1099_v56  ;;  %2372 = vmatmul.mubr.msk.f32.vlgmr.msra.gmra.mrb[16].mxu1 %vm992_vm5, %v1100_v60 }
 0x38c   :  { %2553 = vmatpush3.bf16.msra.mxu0 %v2552_v15  ;;  %2556 = vmatpush3.bf16.msra.mxu1 %v2555_v14  ;;  %v2689_v28 = vunpack.i.h.bf16 %v2687_v23  ;;  %v2688_v29 = vunpack.i.l.bf16 %v2687_v23 }
 0x38d   :  { %v1101_v52 = vmul.f32 %v3064_v9, %v1093_v20  ;;  %v1086_v62 = vsub.f32 2.0, %v1078_v21  ;;  %2385 = vmatprep.mubr.msk.f32.mxu1 %vm2766_vm2, %v2764_v7  ;;  %2560 = vmatprep.subr.bf16.mxu1 %v2765_v51  ;;  %v1784_v20 = vld [vmem:[%s3270_s5 + $0x20] sm:$0xff]  ;;  %v1785_v21 = vld [vmem:[%s3270_s5 + $0x28] sm:$0xff] }
 0x38e   :  { %v2724_v26 = vpop.eup %2723  ;;  %2378 = vmatprep.mubr.msk.f32.mxu0 %vm2766_vm2, %v2764_v7  ;;  %2557 = vmatprep.subr.bf16.mxu0 %v2765_v51  ;;  %v2558_v32 = vpack.c.bf16 %v2689_v28, %v2688_v29  ;;  %v2563_v23 = vpack.c.bf16 %v1785_v21, %v1784_v20  ;;  %v1789_v28 = vld [vmem:[%s3270_s5 + $0x48] sm:$0xff] }
 0x38f   :  { %v1094_v30 = vmul.f32 %v2722_v31, %v1086_v62  ;;  %v1079_v5 = vmul.f32 %v2724_v26, %v1061_v59  ;;  %2386 = vmatmul.mubr.msk.f32.vlgmr.msra.gmra.mrb[18].mxu1 %vm992_vm5, %v1101_v52  ;;  %v1786_v52 = vld [vmem:[%s3270_s5 + $0x30] sm:$0xff]  ;;  %v1787_v62 = vld [vmem:[%s3270_s5 + $0x38] sm:$0xff] }
 0x390   :  { %2562 = vmatpush3.bf16.msra.mxu1 %v2561_v27  ;;  %2399 = vmatprep.mubr.msk.f32.mxu1 %vm2766_vm2, %v2764_v7  ;;  %v2567_v27 = vpack.c.bf16 %v1787_v62, %v1786_v52 }
 0x391   :  { %v1102_v13 = vmul.f32 %v3069_v19, %v1094_v30  ;;  %v1087_v14 = vsub.f32 2.0, %v1079_v5  ;;  %v1790_v30 = vld [vmem:[%s3270_s5 + $0x50] sm:$0xff]  ;;  %v1791_v5 = vld [vmem:[%s3270_s5 + $0x58] sm:$0xff] }
 0x392   :  { %v2726_v9 = vpop.eup %2725 }
 0x393   :  { %v1095_v34 = vmul.f32 %v2724_v26, %v1087_v14  ;;  %v1080_v35 = vmul.f32 %v2726_v9, %v1064_v11  ;;  %2379 = vmatmul.mubr.msk.f32.vlgmr.msra.gmra.mrb[16].mxu0 %vm992_vm5, %v1102_v13  ;;  %v1788_v26 = vld [vmem:[%s3270_s5 + $0x40] sm:$0xff]  ;;  %v2575_v13 = vpack.c.bf16 %v1791_v5, %v1790_v30 }
 0x394   :  { %2559 = vmatpush3.bf16.msra.mxu0 %v2558_v32  ;;  %2392 = vmatprep.mubr.msk.f32.mxu0 %vm2766_vm2, %v2764_v7  ;;  %v1735_v7 = vsub.s32 2, %v2949_v53  ;;  %v2571_v29 = vpack.c.bf16 %v1789_v28, %v1788_v26  ;;  %v1780_v14 = vld [vmem:[%s3270_s5] sm:$0xff] }
 0x395   :  { %v1103_v51 = vmul.f32 %v3073_v22, %v1095_v34  ;;  %v1088_v36 = vsub.f32 2.0, %v1080_v35  ;;  %2564 = vmatprep.subr.bf16.mxu0 %v2563_v23  ;;  %v1782_v34 = vld [vmem:[%s3270_s5 + $0x10] sm:$0xff]  ;;  %v1783_v35 = vld [vmem:[%s3270_s5 + $0x18] sm:$0xff] }
 0x396   :  { %v1736_v44 = vrot.slane %v2955_v55, %v1735_v7 }
 0x397   :  { %v1096_v37 = vmul.f32 %v2726_v9, %v1088_v36  ;;  %2393 = vmatmul.mubr.msk.f32.vlgmr.msra.gmra.mrb[18].mxu0 %vm992_vm5, %v1103_v51  ;;  %v1781_v9 = vld [vmem:[%s3270_s5 + $0x8] sm:$0xff]  ;;  %v1964_v51 = vld [vmem:[%s3269_s4 + $0x60] sm:$0xff] }
 0x398   :  { %2418 = vmatprep.mubr.msk.f32.mxu0 %vm128_vm1, %v2905_v40  ;;  %2566 = vmatpush3.bf16.msra.mxu0 %v2563_v23  ;;  %v2579_v32 = vpack.c.bf16 %v1781_v9, %v1780_v14  ;;  %v1965_v36 = vld [vmem:[%s3269_s4 + $0x68] sm:$0xff] }
 0x399   :  { %v1104_v19 = vmul.f32 %v3078_v25, %v1096_v37  ;;  %2568 = vmatprep.subr.bf16.mxu0 %v2567_v27  ;;  %v1966_v37 = vld [vmem:[%s3269_s4 + $0x70] sm:$0xff] }
 0x39b   :  { %2400 = vmatmul.mubr.msk.f32.vlgmr.msra.gmra.mrb[20].mxu1 %vm992_vm5, %v1104_v19  ;;  %v2587_v19 = vpack.c.bf16 %v1965_v36, %v1964_v51 }
 0x39c   :  { %2570 = vmatpush3.bf16.msra.mxu0 %v2567_v27 }
 0x39d   :  { %2572 = vmatprep.subr.bf16.mxu0 %v2571_v29  ;;  %2588 = vmatprep.subr.bf16.mxu1 %v2587_v19 }
 0x39e   :  { %2590 = vmatpush3.bf16.msra.mxu1 %v2587_v19 }
 0x3a0   :  { %2574 = vmatpush3.bf16.msra.mxu0 %v2571_v29 }
 0x3a1   :  { %2576 = vmatprep.subr.bf16.mxu0 %v2575_v13 }
 0x3a4   :  { %2578 = vmatpush3.bf16.msra.mxu0 %v2575_v13 }
 0x3a5   :  { %2580 = vmatprep.subr.bf16.mxu0 %v2579_v32 }
 0x3a7   :  { %2419 = vmatmul.mubr.msk.f32.vlgmr.msra.gmra.mrb[20].mxu0 %vm128_vm1, %v2933_v49  ;;  %v2583_v49 = vpack.c.bf16 %v1783_v35, %v1782_v34 }
 0x3a8   :  { %2582 = vmatpush3.bf16.msra.mxu0 %v2579_v32  ;;  %v1982_v32 = vsub.s32 6, %v2949_v53 }
 0x3a9   :  { %2584 = vmatprep.subr.bf16.mxu0 %v2583_v49 }
 0x3aa   :  { %v1983_v34 = vrot.slane %v2955_v55, %v1982_v32 }
 0x3ac   :  { %2586 = vmatpush3.bf16.msra.mxu0 %v2583_v49 }
 0x456   :  { %v1182_v38 = vpop.f32.mrb[10].mxu0 }
 0x457   :  { %v2352_v39 = vpop.f32.mrb[11].mxu0 }
 0x45a   :  { %v1255_v41 = vpop.f32.mrb[12].mxu0 }
 0x45b   :  { %v1256_v63 = vadd.f32 %v1255_v41, %v1182_v38  ;;  %v2359_v42 = vpop.f32.mrb[13].mxu0  ;;  %v1967_v38 = vld [vmem:[%s3269_s4 + $0x78] sm:$0xff]  ;;  %v1968_v41 = vld [vmem:[%s3269_s4 + $0x80] sm:$0xff] }
 0x45c   :  { %v2591_v39 = vpack.c.bf16 %v1967_v38, %v1966_v37 }
 0x45e   :  { %v1334_v16 = vpop.f32.mrb[14].mxu0  ;;  %v1414_v22 = vpop.f32.mrb[16].mxu1  ;;  %2592 = vmatprep.subr.bf16.mxu1 %v2591_v39 }
 0x45f   :  { %v1338_v43 = vadd.f32 %v1334_v16, %v1256_v63  ;;  %v2366_v46 = vpop.f32.mrb[15].mxu0  ;;  %v2373_v47 = vpop.f32.mrb[17].mxu1  ;;  %v1969_v63 = vld [vmem:[%s3269_s4 + $0x88] sm:$0xff]  ;;  %2594 = vmatpush3.bf16.msra.mxu1 %v2591_v39 }
 0x460   :  { %v2595_v42 = vpack.c.bf16 %v1969_v63, %v1968_v41 }
 0x461   :  { %v1418_v48 = vadd.f32 %v1414_v22, %v1338_v43  ;;  %v1770_v43 = vsub.s32 3, %v2949_v53 }
 0x462   :  { %v1569_v40 = vpop.f32.mrb[18].mxu1  ;;  %2596 = vmatprep.subr.bf16.mxu1 %v2595_v42 }
 0x463   :  { %v1737_v50 = vadd.f32 %v1736_v44, %v1418_v48  ;;  %v2387_v25 = vpop.f32.mrb[19].mxu1  ;;  %2598 = vmatpush3.bf16.msra.mxu1 %v2595_v42  ;;  %v1771_v47 = vrot.slane %v2955_v55, %v1770_v43 }
 0x465   :  { %v1739_v54 = vadd.f32 %v1737_v50, %v2863_v24 }
 0x466   :  { %v1496_v57 = vpop.f32.mrb[16].mxu0 }
 0x467   :  { %v1570_v58 = vadd.f32 %v1569_v40, %v1496_v57  ;;  %v2380_v59 = vpop.f32.mrb[17].mxu0  ;;  %v1741_v0 = vsel %vm46_vm0, %v1739_v54, 0.0 }
 0x468   :  { %1742 = vadd.xlane.f32.xlu0 %v1741_v0 }
 0x46a   :  { %v1648_v1 = vpop.f32.mrb[18].mxu0 }
 0x46b   :  { %v1652_v45 = vadd.f32 %v1648_v1, %v1570_v58  ;;  %v2394_v2 = vpop.f32.mrb[19].mxu0 }
 0x46c   :  { %v1970_v2 = vld [vmem:[%s3269_s4 + $0x90] sm:$0xff] }
 0x46e   :  { %v1728_v3 = vpop.f32.mrb[20].mxu1 }
 0x46f   :  { %v1732_v4 = vadd.f32 %v1728_v3, %v1652_v45  ;;  %v2401_v6 = vpop.f32.mrb[21].mxu1  ;;  %v1971_v3 = vld [vmem:[%s3269_s4 + $0x98] sm:$0xff] }
 0x470   :  { %v1972_v6 = vld [vmem:[%s3269_s4 + $0xa0] sm:$0xff] }
 0x471   :  { %v1738_v8 = vadd.f32 %v1736_v44, %v1732_v4  ;;  %v1776_v44 = vsub.s32 4, %v2949_v53  ;;  %v2599_v4 = vpack.c.bf16 %v1971_v3, %v1970_v2  ;;  %v2161_v3 = vld [vmem:[%s3270_s5 + $0x68] ss:$0 sm:$0xff] }
 0x473   :  { %v1740_v10 = vadd.f32 %v1738_v8, %v2888_v33  ;;  %v1777_v25 = vrot.slane %v2955_v55, %v1776_v44  ;;  %2600 = vmatprep.subr.bf16.mxu1 %v2599_v4  ;;  %v1973_v8 = vld [vmem:[%s3269_s4 + $0xa8] sm:$0xff] }
 0x474   :  { %2602 = vmatpush3.bf16.msra.mxu1 %v2599_v4 }
 0x475   :  { %v1744_v11 = vsel %vm46_vm0, %v1740_v10, 0.0 }
 0x476   :  { %1745 = vadd.xlane.f32.xlu1 %v1744_v11  ;;  %v1974_v11 = vld [vmem:[%s3269_s4 + $0xb0] sm:$0xff] }
 0x4f5   :  { %v1743_v12 = vpop.xlane.xlu0 %1742 }
 0x4f6   :  { %v1748_v24 = vmul.f32 0.03125, %v1743_v12  ;;  %v1975_v12 = vld [vmem:[%s3269_s4 + $0xb8] sm:$0xff] }
 0x4f8   :  { %v3132_v56 = vsub.f32 %v1739_v54, %v1748_v24  ;;  %v2607_v24 = vpack.c.bf16 %v1975_v12, %v1974_v11 }
 0x4fa   :  { %v1752_v60 = vmul.f32 %v3132_v56, %v3132_v56 }
 0x4fc   :  { %v1754_v61 = vsel %vm46_vm0, %v1752_v60, 0.0  ;;  %v1977_v60 = vld [vmem:[%s3269_s4 + $0xc8] sm:$0xff] }
 0x4fd   :  { %1755 = vadd.xlane.f32.xlu0 %v1754_v61 }
 0x503   :  { %v1746_v31 = vpop.xlane.xlu1 %1745 }
 0x504   :  { %v1749_v15 = vmul.f32 0.03125, %v1746_v31  ;;  %v1978_v31 = vld [vmem:[%s3269_s4 + $0xd0] sm:$0xff] }
 0x506   :  { %v3137_v17 = vsub.f32 %v1740_v10, %v1749_v15  ;;  %v2603_v10 = vpack.c.bf16 %v1973_v8, %v1972_v6  ;;  %v1979_v15 = vld [vmem:[%s3269_s4 + $0xd8] sm:$0xff] }
 0x508   :  { %v1753_v33 = vmul.f32 %v3137_v17, %v3137_v17  ;;  %2604 = vmatprep.subr.bf16.mxu1 %v2603_v10 }
 0x509   :  { %2606 = vmatpush3.bf16.msra.mxu1 %v2603_v10 }
 0x50a   :  { %v1757_v18 = vsel %vm46_vm0, %v1753_v33, 0.0  ;;  %2608 = vmatprep.subr.bf16.mxu1 %v2607_v24  ;;  %v1950_v33 = vsub.s32 5, %v2949_v53 }
 0x50b   :  { %1758 = vadd.xlane.f32.xlu0 %v1757_v18 }
 0x50c   :  { %v1951_v18 = vrot.slane %v2955_v55, %v1950_v33 }
 0x50d   :  { %2610 = vmatpush3.bf16.msra.mxu1 %v2607_v24 }
 0x58a   :  { %v1756_v7 = vpop.xlane.xlu0 %1755 }
 0x58b   :  { %v1760_v16 = vmul.f32 0.03125, %v1756_v7 }
 0x58d   :  { %v1762_v22 = vadd.f32 1e-12, %v1760_v16 }
 0x58f   :  { %2727 = vrsqrt.f32 %v1762_v22 }
 0x598   :  { %v1759_v46 = vpop.xlane.xlu0 %1758 }
 0x599   :  { %v2728_v48 = vpop.eup %2727  ;;  %v1761_v40 = vmul.f32 0.03125, %v1759_v46 }
 0x59a   :  { %v1766_v50 = vmul.f32 %v2728_v48, %v3132_v56  ;;  %v1976_v56 = vld [vmem:[%s3269_s4 + $0xc0] sm:$0xff] }
 0x59b   :  { %v1763_v54 = vadd.f32 1e-12, %v1761_v40  ;;  %v2611_v61 = vpack.c.bf16 %v1977_v60, %v1976_v56 }
 0x59c   :  { %v1772_v57 = vmul.f32 %v1771_v47, %v1766_v50 }
 0x59d   :  { %2729 = vrsqrt.f32 %v1763_v54  ;;  %2612 = vmatprep.subr.bf16.mxu1 %v2611_v61 }
 0x59e   :  { %v1778_v58 = vadd.f32 %v1777_v25, %v1772_v57  ;;  %2614 = vmatpush3.bf16.msra.mxu1 %v2611_v61  ;;  %v2089_v57 = vsub.s32 7, %v2949_v53 }
 0x5a0   :  { %2429 = vmatprep.mubr.msk.f32.mxu0 %vm46_vm0, %v1778_v58 }
 0x5a7   :  { %v2730_v59 = vpop.eup %2729 }
 0x5a8   :  { %v1767_v0 = vmul.f32 %v2730_v59, %v3137_v17  ;;  %v2615_v17 = vpack.c.bf16 %v1979_v15, %v1978_v31 }
 0x5aa   :  { %v1773_v1 = vmul.f32 %v1771_v47, %v1767_v0  ;;  %2616 = vmatprep.subr.bf16.mxu1 %v2615_v17 }
 0x5ab   :  { %2618 = vmatpush3.bf16.msra.mxu1 %v2615_v17 }
 0x5ac   :  { %v1779_v45 = vadd.f32 %v1777_v25, %v1773_v1 }
 0x5ae   :  { %2430 = vmatmul.mubr.msk.f32.vlgmr.msra.gmra.mrb[20].mxu0 %vm46_vm0, %v1779_v45 }
 0x681   :  { %v2431_v20 = vpop.f32.mrb[20].mxu0 }
 0x682   :  { %v1953_v21 = vadd.f32 %v2431_v20, %v1951_v18  ;;  %v1939_v23 = vpop.f32.mrb[21].mxu0 }
 0x683   :  { %v1952_v52 = vadd.f32 %v1951_v18, %v1939_v23 }
 0x684   :  { %v1957_v62 = vmul.f32 0.70710677, %v1953_v21  ;;  %v1955_v13 = vmul.f32 0.5, %v1953_v21 }
 0x685   :  { %v1956_v26 = vmul.f32 0.70710677, %v1952_v52  ;;  %v1954_v30 = vmul.f32 0.5, %v1952_v52 }
 0x686   :  { %2731 = verf.f32 %v1957_v62 }
 0x687   :  { %2733 = verf.f32 %v1956_v26 }
 0x690   :  { %v2732_v27 = vpop.eup %2731 }
 0x691   :  { %v2734_v28 = vpop.eup %2733  ;;  %v1961_v29 = vadd.f32 1.0, %v2732_v27 }
 0x692   :  { %v1960_v5 = vadd.f32 1.0, %v2734_v28 }
 0x693   :  { %v1963_v9 = vmul.f32 %v1961_v29, %v1955_v13 }
 0x694   :  { %v1962_v14 = vmul.f32 %v1960_v5, %v1954_v30 }
 0x696   :  { %2464 = vmatprep.mubr.f32.mxu1 %v1962_v14 }
 0x697   :  { %2465 = vmatmul.mubr.f32.vlgmr.msra.gmra.mrb[22].mxu1 %v1963_v9 }
 0x76a   :  { %v2466_v35 = vpop.f32.mrb[22].mxu1 }
 0x76b   :  { %v2056_v49 = vadd.f32 %v2466_v35, %v1983_v34  ;;  %v2050_v51 = vpop.f32.mrb[23].mxu1 }
 0x76c   :  { %v2051_v36 = vadd.f32 %v2050_v51, %v1983_v34 }
 0x76d   :  { %v2060_v37 = vadd.f32 %v2056_v49, %v1779_v45 }
 0x76e   :  { %v2059_v19 = vadd.f32 %v2051_v36, %v1778_v58  ;;  %v2739_v58 = vld [vmem:[%s3270_s5 + $0x60] sm:$0xff] }
 0x76f   :  { %v2064_v38 = vsel %vm46_vm0, %v2060_v37, 0.0  ;;  %v2090_v59 = vrot.slane %v2739_v58, %v2089_v57 }
 0x770   :  { %2065 = vadd.xlane.f32.xlu0 %v2064_v38  ;;  %v2061_v39 = vsel %vm46_vm0, %v2059_v19, 0.0 }
 0x771   :  { %2062 = vadd.xlane.f32.xlu1 %v2061_v39 }
 0x7fd   :  { %v2066_v41 = vpop.xlane.xlu0 %2065 }
 0x7fe   :  { %v2068_v63 = vmul.f32 0.03125, %v2066_v41  ;;  %v2063_v42 = vpop.xlane.xlu1 %2062 }
 0x7ff   :  { %v2067_v7 = vmul.f32 0.03125, %v2063_v42 }
 0x800   :  { %v2070_v16 = vsub.f32 %v2060_v37, %v2068_v63 }
 0x801   :  { %v2069_v22 = vsub.f32 %v2059_v19, %v2067_v7 }
 0x802   :  { %v2072_v43 = vmul.f32 %v2070_v16, %v2070_v16 }
 0x803   :  { %v2071_v55 = vmul.f32 %v2069_v22, %v2069_v22 }
 0x804   :  { %v2076_v44 = vsel %vm46_vm0, %v2072_v43, 0.0 }
 0x805   :  { %2077 = vadd.xlane.f32.xlu0 %v2076_v44  ;;  %v2073_v46 = vsel %vm46_vm0, %v2071_v55, 0.0 }
 0x806   :  { %2074 = vadd.xlane.f32.xlu1 %v2073_v46 }
 0x892   :  { %v2078_v47 = vpop.xlane.xlu0 %2077 }
 0x893   :  { %v2080_v48 = vmul.f32 0.03125, %v2078_v47  ;;  %v2075_v40 = vpop.xlane.xlu1 %2074 }
 0x894   :  { %v2079_v50 = vmul.f32 0.03125, %v2075_v40 }
 0x895   :  { %v2082_v25 = vadd.f32 1e-12, %v2080_v48 }
 0x896   :  { %v2081_v54 = vadd.f32 1e-12, %v2079_v50 }
 0x897   :  { %2735 = vrsqrt.f32 %v2082_v25 }
 0x898   :  { %2737 = vrsqrt.f32 %v2081_v54 }
 0x8a1   :  { %v2736_v0 = vpop.eup %2735 }
 0x8a2   :  { %v2738_v1 = vpop.eup %2737  ;;  %v2086_v45 = vmul.f32 %v2736_v0, %v2070_v16 }
 0x8a3   :  { %v2085_v2 = vmul.f32 %v2738_v1, %v2069_v22 }
 0x8a4   :  { %v2092_v4 = vmul.f32 %v2090_v59, %v2086_v45 }
 0x8a5   :  { %v2091_v6 = vmul.f32 %v2090_v59, %v2085_v2 }
 0x8a6   :  { %v2098_v8 = vadd.f32 %v2161_v3, %v2092_v4 }
 0x8a7   :  { %v2097_v10 = vadd.f32 %v2161_v3, %v2091_v6 }
 0x8a8   :  { %2100 = vst.msk [vmem:[#allocation2 + $0x8] sm:$0xff] %vm46_vm0, %v2098_v8 }
 0x8a9   :  { %2099 = vst.msk [vmem:[#allocation2] sm:$0xff] %vm46_vm0, %v2097_v10 }
 0x8aa   :  { %2751 = shalt.err (!%p2748_p4)
}
 0x8ab   :  { %s2752_s30 = scalar_lea.hbm %s3271_s6, 256 }
 0x8ac   :  { %p2753_p5 = scmp.ne.s32.totalorder %s3271_s6, %s2752_s30  ;;  %p2756_p6 = scmp.lt.u32.totalorder %s2752_s30, %s3271_s6 }
 0x8ae   :  { %p2758_p7 = pnand %p2756_p6, %p2753_p5 }
 0x8b0   :  { %2761 = shalt.err (!%p2758_p7)
}
 0x8b1   :  { %s2774_s11 = smov 128   ;;  %s2775_s12 = smov 8  }
 0x8b2   :  { %2112 = dma.vmem_to_hbm [thread:$0]  %s2107_s1, 256, %s3271_s6, [#allocation3], %s2774_s11, %s2774_s11, %s2775_s12  }
 0x8b3   :  { %2762 = dma.done.wait [#allocation3], 256  }
 0x8b4   :  { %2763 = vsyncadd [#allocation3], 4294967040 }
 0x8b5   :  { %2116 = vsyncpa [#allocation3], 1 }

</bundles_post_ra>
